<compile_context>
chip_gen: v7x
topology: tpu7x:2x2x1
jax: 0.10.0
libtpu: 0.0.40
codegen_flags: <defaults>
</compile_context>

<pallas_src>
import jax
import jax.numpy as jnp
from jax.experimental import pallas as pl
from jax.experimental.pallas import tpu as pltpu


def _decoder_step_kernel(
    # --- scalar prefetch (SMEM) ---
    ids_ref,          # (B,) int32 token ids
    # --- inputs ---
    emb_hbm,          # (V, H)  embedding table, stays in HBM (pl.ANY)
    c_prev_ref,       # (B, H)  attention query (previous cell state)
    enc_ref,          # (B, S, H) encoder outputs
    w_lin_a_ref,      # (H, H)  Linear weight rows acting on the attention output
    w_lin_e_ref,      # (H, H)  Linear weight rows acting on the embedding
    b_lin_ref,        # (1, H)
    w_gates_ref,      # (H, 4H) fused LSTM input->gate weight (i|f|g|o)
    b_gates_ref,      # (1, 4H) b_ih + b_hh
    w_logits_ref,     # (H, Vt) logits weight tile (streamed over the V grid axis)
    b_logits_ref,     # (1, Vt)
    # --- outputs ---
    logits_ref,       # (B, Vt)
    h_out_ref,        # (B, H)
    c_out_ref,        # (B, H)
    applied_out_ref,  # (B, H)
    # --- scratch ---
    emb_buf,          # VMEM (B, H)  gathered embedding rows
    h_scr,            # VMEM (B, H)  f32 LSTM output, reused by every vocab tile
    copy_sems,        # DMA semaphores (B,)
):
    j = pl.program_id(0)

    # The recurrent/attention state does not depend on the vocab tile: compute
    # it once at grid step 0 and keep it resident in VMEM scratch.
    @pl.when(j == 0)
    def _compute_state():
        B, H = h_scr.shape

        # 1) Embedding gather: DMA exactly B rows of the (V, H) table from HBM.
        copies = []
        for b in range(B):
            cp = pltpu.make_async_copy(
                emb_hbm.at[pl.ds(ids_ref[b], 1), :],
                emb_buf.at[pl.ds(b, 1), :],
                copy_sems.at[b],
            )
            cp.start()
            copies.append(cp)
        for cp in copies:
            cp.wait()

        c_q = c_prev_ref[...].astype(jnp.float32)                 # (B, H)
        enc = enc_ref[...].astype(jnp.float32)                    # (B, S, H)

        # 2) Attention scores: contract H (lane axis), keep S lane-major in the
        #    (B, S) scores — no transposes anywhere.
        scores = jnp.sum(enc * c_q[:, None, :], axis=2)           # (B, S)
        m = jnp.max(scores, axis=-1, keepdims=True)
        p = jnp.exp(scores - m)
        denom = jnp.sum(p, axis=-1, keepdims=True)
        attn_w = p * pl.reciprocal(denom, approx=True)            # (B, S)

        # 3) Attention-applied context vector.
        applied = jnp.sum(attn_w[:, :, None] * enc, axis=1)       # (B, H)

        emb = emb_buf[...].astype(jnp.float32)                    # (B, H)

        # 4) inputs = Linear(concat(applied, emb)): split row-wise into two
        #    matmuls accumulating in f32 (avoids the lane-axis concat copy).
        lin = (
            jnp.dot(applied, w_lin_a_ref[...], preferred_element_type=jnp.float32)
            + jnp.dot(emb, w_lin_e_ref[...], preferred_element_type=jnp.float32)
            + b_lin_ref[...]
        )                                                         # (B, H)

        # 5) LSTM cell with ZERO initial state (the reference calls lstm()
        #    without a hidden tuple): h0 = c0 = 0, so the hidden-hidden matmul
        #    vanishes exactly and the forget gate multiplies c0 == 0.
        gates = (
            jnp.dot(lin, w_gates_ref[...], preferred_element_type=jnp.float32)
            + b_gates_ref[...]
        )                                                         # (B, 4H)
        i_g = jax.nn.sigmoid(gates[:, 0 * H:1 * H])
        g_g = jnp.tanh(gates[:, 2 * H:3 * H])
        o_g = jax.nn.sigmoid(gates[:, 3 * H:4 * H])
        c_new = i_g * g_g
        h_new = o_g * jnp.tanh(c_new)

        h_scr[...] = h_new
        h_out_ref[...] = h_new.astype(h_out_ref.dtype)
        c_out_ref[...] = c_new.astype(c_out_ref.dtype)
        applied_out_ref[...] = applied.astype(applied_out_ref.dtype)

    # 6) Logits tile: (B, H) @ (H, Vt) — lane-dense Vt output block per step.
    logits_ref[...] = (
        jnp.dot(h_scr[...], w_logits_ref[...], preferred_element_type=jnp.float32)
        + b_logits_ref[...]
    ).astype(logits_ref.dtype)


def decoder_step(x, hidden, encoder_output, params, *, v_tile=512):
    """Pallas TPU forward pass of `Decoder_model`.

    Args:
      x:              (B, 1) int token ids.
      hidden:         (h, c), each (1, B, H). Only c is read (attention query);
                      the LSTM itself runs with zero initial state, matching
                      the PyTorch reference.
      encoder_output: (B, S, H).
      params:         dict of PyTorch-layout parameters (see __main__).
      v_tile:         vocab tile width, a lane-dense multiple of 128. Pick it
                      so H * v_tile * bytes * 2 (double buffering) fits the
                      VMEM budget (e.g. <= 8 MiB per buffer on v7x's 64 MiB TC).

    Returns:
      (logits (B, V), (h_new (1, B, H), c_new (1, B, H)), applied (B, 1, H))
    """
    emb_table = params["embed"].astype(jnp.float32)     # (V, H)
    lin_w = params["linear_w"]                          # (H, 2H)
    lin_b = params["linear_b"]                          # (H,)
    w_ih = params["w_ih"]                               # (4H, H)
    b_ih = params["b_ih"]                               # (4H,)
    b_hh = params["b_hh"]                               # (4H,)
    log_w = params["logits_w"]                          # (V, H)
    log_b = params["logits_b"]                          # (V,)

    V, H = emb_table.shape
    B = x.shape[0]
    S = encoder_output.shape[1]
    assert V % v_tile == 0, "pad V to a multiple of v_tile (and mask the pad)"
    n_v_tiles = V // v_tile

    ids = x.reshape(B).astype(jnp.int32)
    # c = transpose(hidden[1], 0, 1).view(B, H); layer dim is 1 -> plain reshape.
    c_prev = hidden[1].reshape(B, H).astype(jnp.float32)
    enc = encoder_output.astype(jnp.float32)

    # Kernel-side (in, out) weight layouts; concat split row-wise; gates fused.
    w_lin_a = jnp.asarray(lin_w[:, :H].T, jnp.float32)            # (H, H)
    w_lin_e = jnp.asarray(lin_w[:, H:].T, jnp.float32)            # (H, H)
    b_lin = lin_b.reshape(1, H).astype(jnp.float32)
    w_gates = jnp.asarray(w_ih.T, jnp.float32)                    # (H, 4H)
    b_gates = (b_ih + b_hh).reshape(1, 4 * H).astype(jnp.float32)
    w_logits_t = jnp.asarray(log_w.T, jnp.float32)                # (H, V)
    b_logits = log_b.reshape(1, V).astype(jnp.float32)

    grid_spec = pltpu.PrefetchScalarGridSpec(
        num_scalar_prefetch=1,          # token ids -> SMEM, drive the DMA gather
        grid=(n_v_tiles,),
        in_specs=[
            pl.BlockSpec(memory_space=pl.ANY),                    # embedding table (HBM)
            pl.BlockSpec((B, H), lambda j, _: (0, 0)),            # c_prev
            pl.BlockSpec((B, S, H), lambda j, _: (0, 0, 0)),      # encoder_output
            pl.BlockSpec((H, H), lambda j, _: (0, 0)),            # w_lin_a
            pl.BlockSpec((H, H), lambda j, _: (0, 0)),            # w_lin_e
            pl.BlockSpec((1, H), lambda j, _: (0, 0)),            # b_lin
            pl.BlockSpec((H, 4 * H), lambda j, _: (0, 0)),        # w_gates
            pl.BlockSpec((1, 4 * H), lambda j, _: (0, 0)),        # b_gates
            pl.BlockSpec((H, v_tile), lambda j, _: (0, j)),       # logits weight tile
            pl.BlockSpec((1, v_tile), lambda j, _: (0, j)),       # logits bias tile
        ],
        out_specs=[
            pl.BlockSpec((B, v_tile), lambda j, _: (0, j)),       # logits
            pl.BlockSpec((B, H), lambda j, _: (0, 0)),            # h_new
            pl.BlockSpec((B, H), lambda j, _: (0, 0)),            # c_new
            pl.BlockSpec((B, H), lambda j, _: (0, 0)),            # attention applied
        ],
        scratch_shapes=[
            pltpu.VMEM((B, H), jnp.float32),      # gathered embedding rows
            pltpu.VMEM((B, H), jnp.float32),      # LSTM output shared by all V tiles
            pltpu.SemaphoreType.DMA((B,)),
        ],
    )

    out_shape = (
        jax.ShapeDtypeStruct((B, V), jnp.float32),
        jax.ShapeDtypeStruct((B, H), jnp.float32),
        jax.ShapeDtypeStruct((B, H), jnp.float32),
        jax.ShapeDtypeStruct((B, H), jnp.float32),
    )

    logits, h_new, c_new, applied = pl.pallas_call(
        _decoder_step_kernel,
        out_shape=out_shape,
        grid_spec=grid_spec,
        compiler_params=pltpu.CompilerParams(
            # The small state outputs are revisited across the V axis, so it is
            # kept "arbitrary". (A v7x-specific variant recomputes the state per
            # tile and marks this axis "parallel" to shard vocab tiles over both
            # TensorCores.)
            dimension_semantics=("arbitrary",),
            vmem_limit_bytes=32 * 1024 * 1024,
        ),
    )(
        ids, emb_table, c_prev, enc,
        w_lin_a, w_lin_e, b_lin, w_gates, b_gates, w_logits_t, b_logits,
    )

    hidden_new = (h_new.reshape(1, B, H), c_new.reshape(1, B, H))
    return logits, hidden_new, applied.reshape(B, 1, H)


def _reference(x, hidden, encoder_output, params):
    """Pure-JAX reference mirroring the PyTorch forward (for verification)."""
    B = x.shape[0]
    H = params["embed"].shape[1]
    emb = params["embed"][x.reshape(B)]                           # (B, H)
    c_q = hidden[1].reshape(B, H)
    scores = jnp.einsum("bsh,bh->bs", encoder_output, c_q)
    attn_w = jax.nn.softmax(scores, axis=-1)
    applied = jnp.einsum("bs,bsh->bh", attn_w, encoder_output)
    inputs = (jnp.concatenate([applied, emb], axis=-1) @ params["linear_w"].T
              + params["linear_b"])
    # LSTM with zero initial state (matches lstm(inputs) with no hidden arg).
    gates = inputs @ params["w_ih"].T + params["b_ih"] + params["b_hh"]
    i, f, g, o = jnp.split(gates, 4, axis=-1)
    c_new = jax.nn.sigmoid(i) * jnp.tanh(g)
    h_new = jax.nn.sigmoid(o) * jnp.tanh(c_new)
    logits = h_new @ params["logits_w"].T + params["logits_b"]
    return logits, h_new, c_new, applied


if __name__ == "__main__":
    B, S, H, V = 8, 16, 128, 2048     # small, TPU-aligned (lanes=128, sublanes=8)
    V_TILE = 512

    key = jax.random.PRNGKey(0)
    ks = jax.random.split(key, 13)
    s = 0.1
    params = {
        "embed": jax.random.normal(ks[0], (V, H), jnp.float32) * s,
        "linear_w": jax.random.normal(ks[1], (H, 2 * H), jnp.float32) * s,
        "linear_b": jax.random.normal(ks[2], (H,), jnp.float32) * s,
        "w_ih": jax.random.normal(ks[3], (4 * H, H), jnp.float32) * s,
        "b_ih": jax.random.normal(ks[4], (4 * H,), jnp.float32) * s,
        # w_hh is part of the module but contributes nothing (zero initial h0).
        "w_hh": jax.random.normal(ks[5], (4 * H, H), jnp.float32) * s,
        "b_hh": jax.random.normal(ks[6], (4 * H,), jnp.float32) * s,
        "logits_w": jax.random.normal(ks[7], (V, H), jnp.float32) * s,
        "logits_b": jax.random.normal(ks[8], (V,), jnp.float32) * s,
    }

    x = jax.random.randint(ks[9], (B, 1), 0, V, dtype=jnp.int32)
    h_prev = jax.random.normal(ks[10], (1, B, H), jnp.float32)
    c_prev = jax.random.normal(ks[11], (1, B, H), jnp.float32) * 0.5
    encoder_output = jax.random.normal(ks[12], (B, S, H), jnp.float32)

    logits, (h_new, c_new), applied = decoder_step(
        x, (h_prev, c_prev), encoder_output, params, v_tile=V_TILE)
    jax.block_until_ready((logits, h_new, c_new, applied))

    ref_logits, ref_h, ref_c, ref_applied = _reference(
        x, (h_prev, c_prev), encoder_output, params)

    def ok(a, b):
        return bool(jnp.allclose(a, b, rtol=2e-2, atol=2e-2))

    assert logits.shape == (B, V) and h_new.shape == (1, B, H)
    assert c_new.shape == (1, B, H) and applied.shape == (B, 1, H)
    assert ok(logits, ref_logits), "logits mismatch"
    assert ok(h_new.reshape(B, H), ref_h), "h_new mismatch"
    assert ok(c_new.reshape(B, H), ref_c), "c_new mismatch"
    assert ok(applied.reshape(B, H), ref_applied), "attention context mismatch"
    print("KERNEL_OK")
</pallas_src>

<mosaic_0001>
module attributes {stable_mosaic.version = 11 : i64} {
  func.func @_decoder_step_kernel(%arg0: i32, %arg1: memref<8xi32, #tpu.memory_space<smem>>, %arg2: memref<2048x128xf32, #tpu.memory_space<any>>, %arg3: memref<8x128xf32, #tpu.memory_space<vmem>>, %arg4: memref<8x16x128xf32, #tpu.memory_space<vmem>>, %arg5: memref<128x128xf32, #tpu.memory_space<vmem>>, %arg6: memref<128x128xf32, #tpu.memory_space<vmem>>, %arg7: memref<1x128xf32, #tpu.memory_space<vmem>>, %arg8: memref<128x512xf32, #tpu.memory_space<vmem>>, %arg9: memref<1x512xf32, #tpu.memory_space<vmem>>, %arg10: memref<128x512xf32, #tpu.memory_space<vmem>>, %arg11: memref<1x512xf32, #tpu.memory_space<vmem>>, %arg12: memref<8x512xf32, #tpu.memory_space<vmem>>, %arg13: memref<8x128xf32, #tpu.memory_space<vmem>>, %arg14: memref<8x128xf32, #tpu.memory_space<vmem>>, %arg15: memref<8x128xf32, #tpu.memory_space<vmem>>, %arg16: memref<8x128xf32, #tpu.memory_space<vmem>>, %arg17: memref<8x128xf32, #tpu.memory_space<vmem>>, %arg18: memref<8x!tpu.dma_semaphore, #tpu.memory_space<semaphore_mem>>) attributes {dimension_semantics = [#tpu.dimension_semantics<arbitrary>], iteration_bounds = array<i64: 4>, scalar_prefetch = 1 : i64, scratch_operands = 3 : i64, tpu.core_type = #tpu.core_type<tc>, window_params = [{}, {pipeline_mode = #tpu.pipeline_mode<synchronous>, transform_indices = @transform_1, window_bounds = array<i64: 8, 128>}, {pipeline_mode = #tpu.pipeline_mode<synchronous>, transform_indices = @transform_2, window_bounds = array<i64: 8, 16, 128>}, {pipeline_mode = #tpu.pipeline_mode<synchronous>, transform_indices = @transform_3, window_bounds = array<i64: 128, 128>}, {pipeline_mode = #tpu.pipeline_mode<synchronous>, transform_indices = @transform_4, window_bounds = array<i64: 128, 128>}, {pipeline_mode = #tpu.pipeline_mode<synchronous>, transform_indices = @transform_5, window_bounds = array<i64: 1, 128>}, {pipeline_mode = #tpu.pipeline_mode<synchronous>, transform_indices = @transform_6, window_bounds = array<i64: 128, 512>}, {pipeline_mode = #tpu.pipeline_mode<synchronous>, transform_indices = @transform_7, window_bounds = array<i64: 1, 512>}, {transform_indices = @transform_8, window_bounds = array<i64: 128, 512>}, {transform_indices = @transform_9, window_bounds = array<i64: 1, 512>}, {transform_indices = @transform_10, window_bounds = array<i64: 8, 512>}, {pipeline_mode = #tpu.pipeline_mode<synchronous>, transform_indices = @transform_11, window_bounds = array<i64: 8, 128>}, {pipeline_mode = #tpu.pipeline_mode<synchronous>, transform_indices = @transform_12, window_bounds = array<i64: 8, 128>}, {pipeline_mode = #tpu.pipeline_mode<synchronous>, transform_indices = @transform_13, window_bounds = array<i64: 8, 128>}]} {
    %c0_i32 = arith.constant 0 : i32
    %0 = arith.cmpi eq, %arg0, %c0_i32 : i32
    %1 = arith.extui %0 : i1 to i32
    %c0_i32_0 = arith.constant 0 : i32
    %2 = arith.cmpi ne, %1, %c0_i32_0 : i32
    scf.if %2 {
      %c0_8 = arith.constant 0 : index
      %10 = memref.load %arg1[%c0_8] : memref<8xi32, #tpu.memory_space<smem>>
      %c0_i32_9 = arith.constant 0 : i32
      %c0_i32_10 = arith.constant 0 : i32
      %11 = tpu.memref_slice %arg2[%10, %c0_i32_10] : memref<2048x128xf32, #tpu.memory_space<any>> -> memref<1x128xf32, #tpu.memory_space<any>>
      %c0_i32_11 = arith.constant 0 : i32
      %c0_i32_12 = arith.constant 0 : i32
      %12 = tpu.memref_slice %arg16[%c0_i32_11, %c0_i32_12] : memref<8x128xf32, #tpu.memory_space<vmem>> -> memref<1x128xf32, #tpu.memory_space<vmem>>
      %13 = tpu.memref_slice %arg18[%c0_i32_9] : memref<8x!tpu.dma_semaphore, #tpu.memory_space<semaphore_mem>> -> memref<1x!tpu.dma_semaphore, #tpu.memory_space<semaphore_mem>>
      %14 = tpu.memref_squeeze %13 : memref<1x!tpu.dma_semaphore, #tpu.memory_space<semaphore_mem>> -> memref<!tpu.dma_semaphore, #tpu.memory_space<semaphore_mem>>
      tpu.enqueue_dma source(%11 : memref<1x128xf32, #tpu.memory_space<any>>) target(%12 : memref<1x128xf32, #tpu.memory_space<vmem>>) target_semaphore(%14 : memref<!tpu.dma_semaphore, #tpu.memory_space<semaphore_mem>>)
      %c1 = arith.constant 1 : index
      %15 = memref.load %arg1[%c1] : memref<8xi32, #tpu.memory_space<smem>>
      %c1_i32 = arith.constant 1 : i32
      %c0_i32_13 = arith.constant 0 : i32
      %16 = tpu.memref_slice %arg2[%15, %c0_i32_13] : memref<2048x128xf32, #tpu.memory_space<any>> -> memref<1x128xf32, #tpu.memory_space<any>>
      %c1_i32_14 = arith.constant 1 : i32
      %c0_i32_15 = arith.constant 0 : i32
      %17 = tpu.memref_slice %arg16[%c1_i32_14, %c0_i32_15] : memref<8x128xf32, #tpu.memory_space<vmem>> -> memref<1x128xf32, #tpu.memory_space<vmem>>
      %18 = tpu.memref_slice %arg18[%c1_i32] : memref<8x!tpu.dma_semaphore, #tpu.memory_space<semaphore_mem>> -> memref<1x!tpu.dma_semaphore, #tpu.memory_space<semaphore_mem>>
      %19 = tpu.memref_squeeze %18 : memref<1x!tpu.dma_semaphore, #tpu.memory_space<semaphore_mem>> -> memref<!tpu.dma_semaphore, #tpu.memory_space<semaphore_mem>>
      tpu.enqueue_dma source(%16 : memref<1x128xf32, #tpu.memory_space<any>>) target(%17 : memref<1x128xf32, #tpu.memory_space<vmem>>) target_semaphore(%19 : memref<!tpu.dma_semaphore, #tpu.memory_space<semaphore_mem>>)
      %c2 = arith.constant 2 : index
      %20 = memref.load %arg1[%c2] : memref<8xi32, #tpu.memory_space<smem>>
      %c2_i32 = arith.constant 2 : i32
      %c0_i32_16 = arith.constant 0 : i32
      %21 = tpu.memref_slice %arg2[%20, %c0_i32_16] : memref<2048x128xf32, #tpu.memory_space<any>> -> memref<1x128xf32, #tpu.memory_space<any>>
      %c2_i32_17 = arith.constant 2 : i32
      %c0_i32_18 = arith.constant 0 : i32
      %22 = tpu.memref_slice %arg16[%c2_i32_17, %c0_i32_18] : memref<8x128xf32, #tpu.memory_space<vmem>> -> memref<1x128xf32, #tpu.memory_space<vmem>>
      %23 = tpu.memref_slice %arg18[%c2_i32] : memref<8x!tpu.dma_semaphore, #tpu.memory_space<semaphore_mem>> -> memref<1x!tpu.dma_semaphore, #tpu.memory_space<semaphore_mem>>
      %24 = tpu.memref_squeeze %23 : memref<1x!tpu.dma_semaphore, #tpu.memory_space<semaphore_mem>> -> memref<!tpu.dma_semaphore, #tpu.memory_space<semaphore_mem>>
      tpu.enqueue_dma source(%21 : memref<1x128xf32, #tpu.memory_space<any>>) target(%22 : memref<1x128xf32, #tpu.memory_space<vmem>>) target_semaphore(%24 : memref<!tpu.dma_semaphore, #tpu.memory_space<semaphore_mem>>)
      %c3 = arith.constant 3 : index
      %25 = memref.load %arg1[%c3] : memref<8xi32, #tpu.memory_space<smem>>
      %c3_i32 = arith.constant 3 : i32
      %c0_i32_19 = arith.constant 0 : i32
      %26 = tpu.memref_slice %arg2[%25, %c0_i32_19] : memref<2048x128xf32, #tpu.memory_space<any>> -> memref<1x128xf32, #tpu.memory_space<any>>
      %c3_i32_20 = arith.constant 3 : i32
      %c0_i32_21 = arith.constant 0 : i32
      %27 = tpu.memref_slice %arg16[%c3_i32_20, %c0_i32_21] : memref<8x128xf32, #tpu.memory_space<vmem>> -> memref<1x128xf32, #tpu.memory_space<vmem>>
      %28 = tpu.memref_slice %arg18[%c3_i32] : memref<8x!tpu.dma_semaphore, #tpu.memory_space<semaphore_mem>> -> memref<1x!tpu.dma_semaphore, #tpu.memory_space<semaphore_mem>>
      %29 = tpu.memref_squeeze %28 : memref<1x!tpu.dma_semaphore, #tpu.memory_space<semaphore_mem>> -> memref<!tpu.dma_semaphore, #tpu.memory_space<semaphore_mem>>
      tpu.enqueue_dma source(%26 : memref<1x128xf32, #tpu.memory_space<any>>) target(%27 : memref<1x128xf32, #tpu.memory_space<vmem>>) target_semaphore(%29 : memref<!tpu.dma_semaphore, #tpu.memory_space<semaphore_mem>>)
      %c4 = arith.constant 4 : index
      %30 = memref.load %arg1[%c4] : memref<8xi32, #tpu.memory_space<smem>>
      %c4_i32 = arith.constant 4 : i32
      %c0_i32_22 = arith.constant 0 : i32
      %31 = tpu.memref_slice %arg2[%30, %c0_i32_22] : memref<2048x128xf32, #tpu.memory_space<any>> -> memref<1x128xf32, #tpu.memory_space<any>>
      %c4_i32_23 = arith.constant 4 : i32
      %c0_i32_24 = arith.constant 0 : i32
      %32 = tpu.memref_slice %arg16[%c4_i32_23, %c0_i32_24] : memref<8x128xf32, #tpu.memory_space<vmem>> -> memref<1x128xf32, #tpu.memory_space<vmem>>
      %33 = tpu.memref_slice %arg18[%c4_i32] : memref<8x!tpu.dma_semaphore, #tpu.memory_space<semaphore_mem>> -> memref<1x!tpu.dma_semaphore, #tpu.memory_space<semaphore_mem>>
      %34 = tpu.memref_squeeze %33 : memref<1x!tpu.dma_semaphore, #tpu.memory_space<semaphore_mem>> -> memref<!tpu.dma_semaphore, #tpu.memory_space<semaphore_mem>>
      tpu.enqueue_dma source(%31 : memref<1x128xf32, #tpu.memory_space<any>>) target(%32 : memref<1x128xf32, #tpu.memory_space<vmem>>) target_semaphore(%34 : memref<!tpu.dma_semaphore, #tpu.memory_space<semaphore_mem>>)
      %c5 = arith.constant 5 : index
      %35 = memref.load %arg1[%c5] : memref<8xi32, #tpu.memory_space<smem>>
      %c5_i32 = arith.constant 5 : i32
      %c0_i32_25 = arith.constant 0 : i32
      %36 = tpu.memref_slice %arg2[%35, %c0_i32_25] : memref<2048x128xf32, #tpu.memory_space<any>> -> memref<1x128xf32, #tpu.memory_space<any>>
      %c5_i32_26 = arith.constant 5 : i32
      %c0_i32_27 = arith.constant 0 : i32
      %37 = tpu.memref_slice %arg16[%c5_i32_26, %c0_i32_27] : memref<8x128xf32, #tpu.memory_space<vmem>> -> memref<1x128xf32, #tpu.memory_space<vmem>>
      %38 = tpu.memref_slice %arg18[%c5_i32] : memref<8x!tpu.dma_semaphore, #tpu.memory_space<semaphore_mem>> -> memref<1x!tpu.dma_semaphore, #tpu.memory_space<semaphore_mem>>
      %39 = tpu.memref_squeeze %38 : memref<1x!tpu.dma_semaphore, #tpu.memory_space<semaphore_mem>> -> memref<!tpu.dma_semaphore, #tpu.memory_space<semaphore_mem>>
      tpu.enqueue_dma source(%36 : memref<1x128xf32, #tpu.memory_space<any>>) target(%37 : memref<1x128xf32, #tpu.memory_space<vmem>>) target_semaphore(%39 : memref<!tpu.dma_semaphore, #tpu.memory_space<semaphore_mem>>)
      %c6 = arith.constant 6 : index
      %40 = memref.load %arg1[%c6] : memref<8xi32, #tpu.memory_space<smem>>
      %c6_i32 = arith.constant 6 : i32
      %c0_i32_28 = arith.constant 0 : i32
      %41 = tpu.memref_slice %arg2[%40, %c0_i32_28] : memref<2048x128xf32, #tpu.memory_space<any>> -> memref<1x128xf32, #tpu.memory_space<any>>
      %c6_i32_29 = arith.constant 6 : i32
      %c0_i32_30 = arith.constant 0 : i32
      %42 = tpu.memref_slice %arg16[%c6_i32_29, %c0_i32_30] : memref<8x128xf32, #tpu.memory_space<vmem>> -> memref<1x128xf32, #tpu.memory_space<vmem>>
      %43 = tpu.memref_slice %arg18[%c6_i32] : memref<8x!tpu.dma_semaphore, #tpu.memory_space<semaphore_mem>> -> memref<1x!tpu.dma_semaphore, #tpu.memory_space<semaphore_mem>>
      %44 = tpu.memref_squeeze %43 : memref<1x!tpu.dma_semaphore, #tpu.memory_space<semaphore_mem>> -> memref<!tpu.dma_semaphore, #tpu.memory_space<semaphore_mem>>
      tpu.enqueue_dma source(%41 : memref<1x128xf32, #tpu.memory_space<any>>) target(%42 : memref<1x128xf32, #tpu.memory_space<vmem>>) target_semaphore(%44 : memref<!tpu.dma_semaphore, #tpu.memory_space<semaphore_mem>>)
      %c7 = arith.constant 7 : index
      %45 = memref.load %arg1[%c7] : memref<8xi32, #tpu.memory_space<smem>>
      %c7_i32 = arith.constant 7 : i32
      %c0_i32_31 = arith.constant 0 : i32
      %46 = tpu.memref_slice %arg2[%45, %c0_i32_31] : memref<2048x128xf32, #tpu.memory_space<any>> -> memref<1x128xf32, #tpu.memory_space<any>>
      %c7_i32_32 = arith.constant 7 : i32
      %c0_i32_33 = arith.constant 0 : i32
      %47 = tpu.memref_slice %arg16[%c7_i32_32, %c0_i32_33] : memref<8x128xf32, #tpu.memory_space<vmem>> -> memref<1x128xf32, #tpu.memory_space<vmem>>
      %48 = tpu.memref_slice %arg18[%c7_i32] : memref<8x!tpu.dma_semaphore, #tpu.memory_space<semaphore_mem>> -> memref<1x!tpu.dma_semaphore, #tpu.memory_space<semaphore_mem>>
      %49 = tpu.memref_squeeze %48 : memref<1x!tpu.dma_semaphore, #tpu.memory_space<semaphore_mem>> -> memref<!tpu.dma_semaphore, #tpu.memory_space<semaphore_mem>>
      tpu.enqueue_dma source(%46 : memref<1x128xf32, #tpu.memory_space<any>>) target(%47 : memref<1x128xf32, #tpu.memory_space<vmem>>) target_semaphore(%49 : memref<!tpu.dma_semaphore, #tpu.memory_space<semaphore_mem>>)
      %c0_i32_34 = arith.constant 0 : i32
      %c0_i32_35 = arith.constant 0 : i32
      %50 = tpu.memref_slice %arg2[%10, %c0_i32_35] : memref<2048x128xf32, #tpu.memory_space<any>> -> memref<1x128xf32, #tpu.memory_space<any>>
      %c0_i32_36 = arith.constant 0 : i32
      %c0_i32_37 = arith.constant 0 : i32
      %51 = tpu.memref_slice %arg16[%c0_i32_36, %c0_i32_37] : memref<8x128xf32, #tpu.memory_space<vmem>> -> memref<1x128xf32, #tpu.memory_space<vmem>>
      %52 = tpu.memref_slice %arg18[%c0_i32_34] : memref<8x!tpu.dma_semaphore, #tpu.memory_space<semaphore_mem>> -> memref<1x!tpu.dma_semaphore, #tpu.memory_space<semaphore_mem>>
      %53 = tpu.memref_squeeze %52 : memref<1x!tpu.dma_semaphore, #tpu.memory_space<semaphore_mem>> -> memref<!tpu.dma_semaphore, #tpu.memory_space<semaphore_mem>>
      tpu.wait_dma2 semaphore(%53 : memref<!tpu.dma_semaphore, #tpu.memory_space<semaphore_mem>>) src(%50 : memref<1x128xf32, #tpu.memory_space<any>>) dst(%51 : memref<1x128xf32, #tpu.memory_space<vmem>>)
      %c1_i32_38 = arith.constant 1 : i32
      %c0_i32_39 = arith.constant 0 : i32
      %54 = tpu.memref_slice %arg2[%15, %c0_i32_39] : memref<2048x128xf32, #tpu.memory_space<any>> -> memref<1x128xf32, #tpu.memory_space<any>>
      %c1_i32_40 = arith.constant 1 : i32
      %c0_i32_41 = arith.constant 0 : i32
      %55 = tpu.memref_slice %arg16[%c1_i32_40, %c0_i32_41] : memref<8x128xf32, #tpu.memory_space<vmem>> -> memref<1x128xf32, #tpu.memory_space<vmem>>
      %56 = tpu.memref_slice %arg18[%c1_i32_38] : memref<8x!tpu.dma_semaphore, #tpu.memory_space<semaphore_mem>> -> memref<1x!tpu.dma_semaphore, #tpu.memory_space<semaphore_mem>>
      %57 = tpu.memref_squeeze %56 : memref<1x!tpu.dma_semaphore, #tpu.memory_space<semaphore_mem>> -> memref<!tpu.dma_semaphore, #tpu.memory_space<semaphore_mem>>
      tpu.wait_dma2 semaphore(%57 : memref<!tpu.dma_semaphore, #tpu.memory_space<semaphore_mem>>) src(%54 : memref<1x128xf32, #tpu.memory_space<any>>) dst(%55 : memref<1x128xf32, #tpu.memory_space<vmem>>)
      %c2_i32_42 = arith.constant 2 : i32
      %c0_i32_43 = arith.constant 0 : i32
      %58 = tpu.memref_slice %arg2[%20, %c0_i32_43] : memref<2048x128xf32, #tpu.memory_space<any>> -> memref<1x128xf32, #tpu.memory_space<any>>
      %c2_i32_44 = arith.constant 2 : i32
      %c0_i32_45 = arith.constant 0 : i32
      %59 = tpu.memref_slice %arg16[%c2_i32_44, %c0_i32_45] : memref<8x128xf32, #tpu.memory_space<vmem>> -> memref<1x128xf32, #tpu.memory_space<vmem>>
      %60 = tpu.memref_slice %arg18[%c2_i32_42] : memref<8x!tpu.dma_semaphore, #tpu.memory_space<semaphore_mem>> -> memref<1x!tpu.dma_semaphore, #tpu.memory_space<semaphore_mem>>
      %61 = tpu.memref_squeeze %60 : memref<1x!tpu.dma_semaphore, #tpu.memory_space<semaphore_mem>> -> memref<!tpu.dma_semaphore, #tpu.memory_space<semaphore_mem>>
      tpu.wait_dma2 semaphore(%61 : memref<!tpu.dma_semaphore, #tpu.memory_space<semaphore_mem>>) src(%58 : memref<1x128xf32, #tpu.memory_space<any>>) dst(%59 : memref<1x128xf32, #tpu.memory_space<vmem>>)
      %c3_i32_46 = arith.constant 3 : i32
      %c0_i32_47 = arith.constant 0 : i32
      %62 = tpu.memref_slice %arg2[%25, %c0_i32_47] : memref<2048x128xf32, #tpu.memory_space<any>> -> memref<1x128xf32, #tpu.memory_space<any>>
      %c3_i32_48 = arith.constant 3 : i32
      %c0_i32_49 = arith.constant 0 : i32
      %63 = tpu.memref_slice %arg16[%c3_i32_48, %c0_i32_49] : memref<8x128xf32, #tpu.memory_space<vmem>> -> memref<1x128xf32, #tpu.memory_space<vmem>>
      %64 = tpu.memref_slice %arg18[%c3_i32_46] : memref<8x!tpu.dma_semaphore, #tpu.memory_space<semaphore_mem>> -> memref<1x!tpu.dma_semaphore, #tpu.memory_space<semaphore_mem>>
      %65 = tpu.memref_squeeze %64 : memref<1x!tpu.dma_semaphore, #tpu.memory_space<semaphore_mem>> -> memref<!tpu.dma_semaphore, #tpu.memory_space<semaphore_mem>>
      tpu.wait_dma2 semaphore(%65 : memref<!tpu.dma_semaphore, #tpu.memory_space<semaphore_mem>>) src(%62 : memref<1x128xf32, #tpu.memory_space<any>>) dst(%63 : memref<1x128xf32, #tpu.memory_space<vmem>>)
      %c4_i32_50 = arith.constant 4 : i32
      %c0_i32_51 = arith.constant 0 : i32
      %66 = tpu.memref_slice %arg2[%30, %c0_i32_51] : memref<2048x128xf32, #tpu.memory_space<any>> -> memref<1x128xf32, #tpu.memory_space<any>>
      %c4_i32_52 = arith.constant 4 : i32
      %c0_i32_53 = arith.constant 0 : i32
      %67 = tpu.memref_slice %arg16[%c4_i32_52, %c0_i32_53] : memref<8x128xf32, #tpu.memory_space<vmem>> -> memref<1x128xf32, #tpu.memory_space<vmem>>
      %68 = tpu.memref_slice %arg18[%c4_i32_50] : memref<8x!tpu.dma_semaphore, #tpu.memory_space<semaphore_mem>> -> memref<1x!tpu.dma_semaphore, #tpu.memory_space<semaphore_mem>>
      %69 = tpu.memref_squeeze %68 : memref<1x!tpu.dma_semaphore, #tpu.memory_space<semaphore_mem>> -> memref<!tpu.dma_semaphore, #tpu.memory_space<semaphore_mem>>
      tpu.wait_dma2 semaphore(%69 : memref<!tpu.dma_semaphore, #tpu.memory_space<semaphore_mem>>) src(%66 : memref<1x128xf32, #tpu.memory_space<any>>) dst(%67 : memref<1x128xf32, #tpu.memory_space<vmem>>)
      %c5_i32_54 = arith.constant 5 : i32
      %c0_i32_55 = arith.constant 0 : i32
      %70 = tpu.memref_slice %arg2[%35, %c0_i32_55] : memref<2048x128xf32, #tpu.memory_space<any>> -> memref<1x128xf32, #tpu.memory_space<any>>
      %c5_i32_56 = arith.constant 5 : i32
      %c0_i32_57 = arith.constant 0 : i32
      %71 = tpu.memref_slice %arg16[%c5_i32_56, %c0_i32_57] : memref<8x128xf32, #tpu.memory_space<vmem>> -> memref<1x128xf32, #tpu.memory_space<vmem>>
      %72 = tpu.memref_slice %arg18[%c5_i32_54] : memref<8x!tpu.dma_semaphore, #tpu.memory_space<semaphore_mem>> -> memref<1x!tpu.dma_semaphore, #tpu.memory_space<semaphore_mem>>
      %73 = tpu.memref_squeeze %72 : memref<1x!tpu.dma_semaphore, #tpu.memory_space<semaphore_mem>> -> memref<!tpu.dma_semaphore, #tpu.memory_space<semaphore_mem>>
      tpu.wait_dma2 semaphore(%73 : memref<!tpu.dma_semaphore, #tpu.memory_space<semaphore_mem>>) src(%70 : memref<1x128xf32, #tpu.memory_space<any>>) dst(%71 : memref<1x128xf32, #tpu.memory_space<vmem>>)
      %c6_i32_58 = arith.constant 6 : i32
      %c0_i32_59 = arith.constant 0 : i32
      %74 = tpu.memref_slice %arg2[%40, %c0_i32_59] : memref<2048x128xf32, #tpu.memory_space<any>> -> memref<1x128xf32, #tpu.memory_space<any>>
      %c6_i32_60 = arith.constant 6 : i32
      %c0_i32_61 = arith.constant 0 : i32
      %75 = tpu.memref_slice %arg16[%c6_i32_60, %c0_i32_61] : memref<8x128xf32, #tpu.memory_space<vmem>> -> memref<1x128xf32, #tpu.memory_space<vmem>>
      %76 = tpu.memref_slice %arg18[%c6_i32_58] : memref<8x!tpu.dma_semaphore, #tpu.memory_space<semaphore_mem>> -> memref<1x!tpu.dma_semaphore, #tpu.memory_space<semaphore_mem>>
      %77 = tpu.memref_squeeze %76 : memref<1x!tpu.dma_semaphore, #tpu.memory_space<semaphore_mem>> -> memref<!tpu.dma_semaphore, #tpu.memory_space<semaphore_mem>>
      tpu.wait_dma2 semaphore(%77 : memref<!tpu.dma_semaphore, #tpu.memory_space<semaphore_mem>>) src(%74 : memref<1x128xf32, #tpu.memory_space<any>>) dst(%75 : memref<1x128xf32, #tpu.memory_space<vmem>>)
      %c7_i32_62 = arith.constant 7 : i32
      %c0_i32_63 = arith.constant 0 : i32
      %78 = tpu.memref_slice %arg2[%45, %c0_i32_63] : memref<2048x128xf32, #tpu.memory_space<any>> -> memref<1x128xf32, #tpu.memory_space<any>>
      %c7_i32_64 = arith.constant 7 : i32
      %c0_i32_65 = arith.constant 0 : i32
      %79 = tpu.memref_slice %arg16[%c7_i32_64, %c0_i32_65] : memref<8x128xf32, #tpu.memory_space<vmem>> -> memref<1x128xf32, #tpu.memory_space<vmem>>
      %80 = tpu.memref_slice %arg18[%c7_i32_62] : memref<8x!tpu.dma_semaphore, #tpu.memory_space<semaphore_mem>> -> memref<1x!tpu.dma_semaphore, #tpu.memory_space<semaphore_mem>>
      %81 = tpu.memref_squeeze %80 : memref<1x!tpu.dma_semaphore, #tpu.memory_space<semaphore_mem>> -> memref<!tpu.dma_semaphore, #tpu.memory_space<semaphore_mem>>
      tpu.wait_dma2 semaphore(%81 : memref<!tpu.dma_semaphore, #tpu.memory_space<semaphore_mem>>) src(%78 : memref<1x128xf32, #tpu.memory_space<any>>) dst(%79 : memref<1x128xf32, #tpu.memory_space<vmem>>)
      %c0_66 = arith.constant 0 : index
      %c0_67 = arith.constant 0 : index
      %82 = vector.load %arg3[%c0_66, %c0_67] : memref<8x128xf32, #tpu.memory_space<vmem>>, vector<8x128xf32>
      %c0_68 = arith.constant 0 : index
      %c0_69 = arith.constant 0 : index
      %c0_70 = arith.constant 0 : index
      %83 = vector.load %arg4[%c0_68, %c0_69, %c0_70] : memref<8x16x128xf32, #tpu.memory_space<vmem>>, vector<8x16x128xf32>
      %84 = vector.shape_cast %82 : vector<8x128xf32> to vector<8x1x128xf32>
      %85 = vector.broadcast %84 : vector<8x1x128xf32> to vector<8x16x128xf32>
      %86 = arith.mulf %83, %85 : vector<8x16x128xf32>
      %cst_71 = arith.constant dense<0.000000e+00> : vector<8x16xf32>
      %87 = vector.multi_reduction <add>, %86, %cst_71 [2] : vector<8x16x128xf32> to vector<8x16xf32>
      %cst_72 = arith.constant dense<0xFF800000> : vector<8xf32>
      %88 = vector.multi_reduction <maximumf>, %87, %cst_72 [1] : vector<8x16xf32> to vector<8xf32>
      %89 = vector.shape_cast %88 : vector<8xf32> to vector<8x1xf32>
      %90 = vector.broadcast %89 : vector<8x1xf32> to vector<8x16xf32>
      %91 = arith.subf %87, %90 : vector<8x16xf32>
      %92 = math.exp %91 : vector<8x16xf32>
      %cst_73 = arith.constant dense<0.000000e+00> : vector<8xf32>
      %93 = vector.multi_reduction <add>, %92, %cst_73 [1] : vector<8x16xf32> to vector<8xf32>
      %94 = vector.shape_cast %93 : vector<8xf32> to vector<8x1xf32>
      %95 = tpu.reciprocal %94 {approx = true} : vector<8x1xf32> -> vector<8x1xf32>
      %96 = vector.broadcast %95 : vector<8x1xf32> to vector<8x16xf32>
      %97 = arith.mulf %92, %96 : vector<8x16xf32>
      %98 = vector.shape_cast %97 : vector<8x16xf32> to vector<8x16x1xf32>
      %99 = vector.broadcast %98 : vector<8x16x1xf32> to vector<8x16x128xf32>
      %100 = arith.mulf %99, %83 : vector<8x16x128xf32>
      %cst_74 = arith.constant dense<0.000000e+00> : vector<8x128xf32>
      %101 = vector.multi_reduction <add>, %100, %cst_74 [1] : vector<8x16x128xf32> to vector<8x128xf32>
      %c0_75 = arith.constant 0 : index
      %c0_76 = arith.constant 0 : index
      %102 = vector.load %arg16[%c0_75, %c0_76] : memref<8x128xf32, #tpu.memory_space<vmem>>, vector<8x128xf32>
      %c0_77 = arith.constant 0 : index
      %c0_78 = arith.constant 0 : index
      %103 = vector.load %arg5[%c0_77, %c0_78] : memref<128x128xf32, #tpu.memory_space<vmem>>, vector<128x128xf32>
      %cst_79 = arith.constant dense<0.000000e+00> : vector<8x128xf32>
      %104 = tpu.matmul %101, %103, %cst_79 {dimension_numbers = #tpu.dot_dimension_numbers<[1], [0], [0], [1], [0, 0, 1, 1], [], []>} : vector<8x128xf32>, vector<128x128xf32>, vector<8x128xf32> -> vector<8x128xf32>
      %c0_80 = arith.constant 0 : index
      %c0_81 = arith.constant 0 : index
      %105 = vector.load %arg6[%c0_80, %c0_81] : memref<128x128xf32, #tpu.memory_space<vmem>>, vector<128x128xf32>
      %cst_82 = arith.constant dense<0.000000e+00> : vector<8x128xf32>
      %106 = tpu.matmul %102, %105, %cst_82 {dimension_numbers = #tpu.dot_dimension_numbers<[1], [0], [0], [1], [0, 0, 1, 1], [], []>} : vector<8x128xf32>, vector<128x128xf32>, vector<8x128xf32> -> vector<8x128xf32>
      %107 = arith.addf %104, %106 : vector<8x128xf32>
      %c0_83 = arith.constant 0 : index
      %c0_84 = arith.constant 0 : index
      %108 = vector.load %arg7[%c0_83, %c0_84] : memref<1x128xf32, #tpu.memory_space<vmem>>, vector<1x128xf32>
      %109 = vector.broadcast %108 : vector<1x128xf32> to vector<8x128xf32>
      %110 = arith.addf %107, %109 : vector<8x128xf32>
      %c0_85 = arith.constant 0 : index
      %c0_86 = arith.constant 0 : index
      %111 = vector.load %arg8[%c0_85, %c0_86] : memref<128x512xf32, #tpu.memory_space<vmem>>, vector<128x512xf32>
      %cst_87 = arith.constant dense<0.000000e+00> : vector<8x512xf32>
      %112 = tpu.matmul %110, %111, %cst_87 {dimension_numbers = #tpu.dot_dimension_numbers<[1], [0], [0], [1], [0, 0, 1, 1], [], []>} : vector<8x128xf32>, vector<128x512xf32>, vector<8x512xf32> -> vector<8x512xf32>
      %c0_88 = arith.constant 0 : index
      %c0_89 = arith.constant 0 : index
      %113 = vector.load %arg9[%c0_88, %c0_89] : memref<1x512xf32, #tpu.memory_space<vmem>>, vector<1x512xf32>
      %114 = vector.broadcast %113 : vector<1x512xf32> to vector<8x512xf32>
      %115 = arith.addf %112, %114 : vector<8x512xf32>
      %116 = vector.extract_strided_slice %115 {offsets = [0, 0], sizes = [8, 128], strides = [1, 1]} : vector<8x512xf32> to vector<8x128xf32>
      %117 = arith.negf %116 : vector<8x128xf32>
      %118 = math.exp %117 : vector<8x128xf32>
      %cst_90 = arith.constant 1.000000e+00 : f32
      %119 = vector.broadcast %cst_90 : f32 to vector<8x128xf32>
      %120 = arith.addf %119, %118 : vector<8x128xf32>
      %121 = arith.divf %119, %120 : vector<8x128xf32>
      %122 = vector.extract_strided_slice %115 {offsets = [0, 256], sizes = [8, 128], strides = [1, 1]} : vector<8x512xf32> to vector<8x128xf32>
      %123 = math.tanh %122 : vector<8x128xf32>
      %124 = vector.extract_strided_slice %115 {offsets = [0, 384], sizes = [8, 128], strides = [1, 1]} : vector<8x512xf32> to vector<8x128xf32>
      %125 = arith.negf %124 : vector<8x128xf32>
      %126 = math.exp %125 : vector<8x128xf32>
      %cst_91 = arith.constant 1.000000e+00 : f32
      %127 = vector.broadcast %cst_91 : f32 to vector<8x128xf32>
      %128 = arith.addf %127, %126 : vector<8x128xf32>
      %129 = arith.divf %127, %128 : vector<8x128xf32>
      %130 = arith.mulf %121, %123 : vector<8x128xf32>
      %131 = math.tanh %130 : vector<8x128xf32>
      %132 = arith.mulf %129, %131 : vector<8x128xf32>
      %c0_92 = arith.constant 0 : index
      %c0_93 = arith.constant 0 : index
      %133 = vector.load %arg17[%c0_92, %c0_93] : memref<8x128xf32, #tpu.memory_space<vmem>>, vector<8x128xf32>
      tpu.vector_store %arg17[%c0_92, %c0_93], %132 {strides = array<i32>} : memref<8x128xf32, #tpu.memory_space<vmem>>, vector<8x128xf32>,
      %c0_94 = arith.constant 0 : index
      %c0_95 = arith.constant 0 : index
      %134 = vector.load %arg13[%c0_94, %c0_95] : memref<8x128xf32, #tpu.memory_space<vmem>>, vector<8x128xf32>
      tpu.vector_store %arg13[%c0_94, %c0_95], %132 {strides = array<i32>} : memref<8x128xf32, #tpu.memory_space<vmem>>, vector<8x128xf32>,
      %c0_96 = arith.constant 0 : index
      %c0_97 = arith.constant 0 : index
      %135 = vector.load %arg14[%c0_96, %c0_97] : memref<8x128xf32, #tpu.memory_space<vmem>>, vector<8x128xf32>
      tpu.vector_store %arg14[%c0_96, %c0_97], %130 {strides = array<i32>} : memref<8x128xf32, #tpu.memory_space<vmem>>, vector<8x128xf32>,
      %c0_98 = arith.constant 0 : index
      %c0_99 = arith.constant 0 : index
      %136 = vector.load %arg15[%c0_98, %c0_99] : memref<8x128xf32, #tpu.memory_space<vmem>>, vector<8x128xf32>
      tpu.vector_store %arg15[%c0_98, %c0_99], %101 {strides = array<i32>} : memref<8x128xf32, #tpu.memory_space<vmem>>, vector<8x128xf32>,
    } else {
    }
    %c0 = arith.constant 0 : index
    %c0_1 = arith.constant 0 : index
    %3 = vector.load %arg17[%c0, %c0_1] : memref<8x128xf32, #tpu.memory_space<vmem>>, vector<8x128xf32>
    %c0_2 = arith.constant 0 : index
    %c0_3 = arith.constant 0 : index
    %4 = vector.load %arg10[%c0_2, %c0_3] : memref<128x512xf32, #tpu.memory_space<vmem>>, vector<128x512xf32>
    %cst = arith.constant dense<0.000000e+00> : vector<8x512xf32>
    %5 = tpu.matmul %3, %4, %cst {dimension_numbers = #tpu.dot_dimension_numbers<[1], [0], [0], [1], [0, 0, 1, 1], [], []>} : vector<8x128xf32>, vector<128x512xf32>, vector<8x512xf32> -> vector<8x512xf32>
    %c0_4 = arith.constant 0 : index
    %c0_5 = arith.constant 0 : index
    %6 = vector.load %arg11[%c0_4, %c0_5] : memref<1x512xf32, #tpu.memory_space<vmem>>, vector<1x512xf32>
    %7 = vector.broadcast %6 : vector<1x512xf32> to vector<8x512xf32>
    %8 = arith.addf %5, %7 : vector<8x512xf32>
    %c0_6 = arith.constant 0 : index
    %c0_7 = arith.constant 0 : index
    %9 = vector.load %arg12[%c0_6, %c0_7] : memref<8x512xf32, #tpu.memory_space<vmem>>, vector<8x512xf32>
    tpu.vector_store %arg12[%c0_6, %c0_7], %8 {strides = array<i32>} : memref<8x512xf32, #tpu.memory_space<vmem>>, vector<8x512xf32>,
    return
  }
  func.func @transform_1(%arg0: i32, %arg1: memref<8xi32, #tpu.memory_space<smem>>) -> (i32, i32) {
    %c0_i32 = arith.constant 0 : i32
    %c0_i32_0 = arith.constant 0 : i32
    %c0_i32_1 = arith.constant 0 : i32
    return %c0_i32, %c0_i32_0 : i32, i32
  }
  func.func @transform_2(%arg0: i32, %arg1: memref<8xi32, #tpu.memory_space<smem>>) -> (i32, i32, i32) {
    %c0_i32 = arith.constant 0 : i32
    %c0_i32_0 = arith.constant 0 : i32
    %c0_i32_1 = arith.constant 0 : i32
    %c0_i32_2 = arith.constant 0 : i32
    return %c0_i32, %c0_i32_0, %c0_i32_1 : i32, i32, i32
  }
  func.func @transform_3(%arg0: i32, %arg1: memref<8xi32, #tpu.memory_space<smem>>) -> (i32, i32) {
    %c0_i32 = arith.constant 0 : i32
    %c0_i32_0 = arith.constant 0 : i32
    %c0_i32_1 = arith.constant 0 : i32
    return %c0_i32, %c0_i32_0 : i32, i32
  }
  func.func @transform_4(%arg0: i32, %arg1: memref<8xi32, #tpu.memory_space<smem>>) -> (i32, i32) {
    %c0_i32 = arith.constant 0 : i32
    %c0_i32_0 = arith.constant 0 : i32
    %c0_i32_1 = arith.constant 0 : i32
    return %c0_i32, %c0_i32_0 : i32, i32
  }
  func.func @transform_5(%arg0: i32, %arg1: memref<8xi32, #tpu.memory_space<smem>>) -> (i32, i32) {
    %c0_i32 = arith.constant 0 : i32
    %c0_i32_0 = arith.constant 0 : i32
    %c0_i32_1 = arith.constant 0 : i32
    return %c0_i32, %c0_i32_0 : i32, i32
  }
  func.func @transform_6(%arg0: i32, %arg1: memref<8xi32, #tpu.memory_space<smem>>) -> (i32, i32) {
    %c0_i32 = arith.constant 0 : i32
    %c0_i32_0 = arith.constant 0 : i32
    %c0_i32_1 = arith.constant 0 : i32
    return %c0_i32, %c0_i32_0 : i32, i32
  }
  func.func @transform_7(%arg0: i32, %arg1: memref<8xi32, #tpu.memory_space<smem>>) -> (i32, i32) {
    %c0_i32 = arith.constant 0 : i32
    %c0_i32_0 = arith.constant 0 : i32
    %c0_i32_1 = arith.constant 0 : i32
    return %c0_i32, %c0_i32_0 : i32, i32
  }
  func.func @transform_8(%arg0: i32, %arg1: memref<8xi32, #tpu.memory_space<smem>>) -> (i32, i32) {
    %c0_i32 = arith.constant 0 : i32
    %c0_i32_0 = arith.constant 0 : i32
    return %c0_i32, %arg0 : i32, i32
  }
  func.func @transform_9(%arg0: i32, %arg1: memref<8xi32, #tpu.memory_space<smem>>) -> (i32, i32) {
    %c0_i32 = arith.constant 0 : i32
    %c0_i32_0 = arith.constant 0 : i32
    return %c0_i32, %arg0 : i32, i32
  }
  func.func @transform_10(%arg0: i32, %arg1: memref<8xi32, #tpu.memory_space<smem>>) -> (i32, i32) {
    %c0_i32 = arith.constant 0 : i32
    %c0_i32_0 = arith.constant 0 : i32
    return %c0_i32, %arg0 : i32, i32
  }
  func.func @transform_11(%arg0: i32, %arg1: memref<8xi32, #tpu.memory_space<smem>>) -> (i32, i32) {
    %c0_i32 = arith.constant 0 : i32
    %c0_i32_0 = arith.constant 0 : i32
    %c0_i32_1 = arith.constant 0 : i32
    return %c0_i32, %c0_i32_0 : i32, i32
  }
  func.func @transform_12(%arg0: i32, %arg1: memref<8xi32, #tpu.memory_space<smem>>) -> (i32, i32) {
    %c0_i32 = arith.constant 0 : i32
    %c0_i32_0 = arith.constant 0 : i32
    %c0_i32_1 = arith.constant 0 : i32
    return %c0_i32, %c0_i32_0 : i32, i32
  }
  func.func @transform_13(%arg0: i32, %arg1: memref<8xi32, #tpu.memory_space<smem>>) -> (i32, i32) {
    %c0_i32 = arith.constant 0 : i32
    %c0_i32_0 = arith.constant 0 : i32
    %c0_i32_1 = arith.constant 0 : i32
    return %c0_i32, %c0_i32_0 : i32, i32
  }
}

</mosaic_0001>

<bundles_post_ra>
// kernel: tpu_custom_call.1
= control target key start
LH: loop header
LB: loop body
LE: loop exit
PB: predicated region body
PF: predicated region fallthrough
CT: control target
= control target key end

     0   :  { %s4480_s0 = inlined_call_operand.hbm [shape: s32[8], index: 0, kind: input, shape index: {}]   ;;  %s4481_s1 = inlined_call_operand.hbm [shape: f32[2048,128], index: 1, kind: input, shape index: {}]   ;;  %s4482_s2 = inlined_call_operand.hbm [shape: f32[8,128], index: 2, kind: input, shape index: {}]   ;;  %s4483_s3 = inlined_call_operand.hbm [shape: f32[8,16,128], index: 3, kind: input, shape index: {}]   ;;  %s4484_s4 = inlined_call_operand.hbm [shape: f32[128,128], index: 4, kind: input, shape index: {}]   ;;  %s4485_s5 = inlined_call_operand.hbm [shape: f32[128,128], index: 5, kind: input, shape index: {}]   ;;  %s4486_s6 = inlined_call_operand.vmem [shape: f32[1,128], index: 6, kind: input, shape index: {}]   ;;  %s4487_s7 = inlined_call_operand.hbm [shape: f32[128,512], index: 7, kind: input, shape index: {}]   ;;  %s4488_s8 = inlined_call_operand.vmem [shape: f32[1,512], index: 8, kind: input, shape index: {}]   ;;  %s4489_s9 = inlined_call_operand.hbm [shape: f32[128,2048], index: 9, kind: input, shape index: {}]   ;;  %s4490_s10 = inlined_call_operand.vmem [shape: f32[1,2048], index: 10, kind: input, shape index: {}]   ;;  %s4491_s11 = inlined_call_operand.hbm [shape: f32[8,2048], index: 11, kind: output, shape index: {0}]   ;;  %s4492_s12 = inlined_call_operand.hbm [shape: f32[8,128], index: 12, kind: output, shape index: {1}]   ;;  %s4493_s13 = inlined_call_operand.hbm [shape: f32[8,128], index: 13, kind: output, shape index: {2}]   ;;  %s4494_s14 = inlined_call_operand.hbm [shape: f32[8,128], index: 14, kind: output, shape index: {3}]  }
   0x1   :  { %4509 = sst [smem:[#allocation62_spill]] %s4482_s2  ;;  %s2862_s15 = scalar_lea.hbm %s4480_s0, 16 }
   0x2   :  { %4510 = sst [smem:[#allocation63_spill]] %s4483_s3  ;;  %p2863_p0 = scmp.ne.s32.totalorder %s4480_s0, %s2862_s15 }
   0x3   :  { %4511 = sst [smem:[#allocation64_spill]] %s4484_s4  ;;  %p2866_p1 = scmp.lt.u32.totalorder %s2862_s15, %s4480_s0 }
   0x4   :  { %4512 = sst [smem:[#allocation65_spill]] %s4485_s5 }
   0x5   :  { %4513 = sst [smem:[#allocation66_spill]] %s4487_s7  ;;  %p2868_p2 = pnand %p2866_p1, %p2863_p0 }
   0x6   :  { %4514 = sst [smem:[#allocation67_spill]] %s4488_s8 }
   0x7   :  { %4515 = sst [smem:[#allocation68_spill]] %s4489_s9 }
   0x8   :  { %4516 = sst [smem:[#allocation69_spill]] %s4491_s11 }
   0x9   :  { %4517 = sst [smem:[#allocation70_spill]] %s4492_s12 }
   0xa   :  { %4518 = sst [smem:[#allocation71_spill]] %s4493_s13 }
   0xb   :  { %4519 = sst [smem:[#allocation72_spill]] %s4494_s14 }
   0xc   :  { %2871 = shalt.err (!%p2868_p2)  }
   0xd   :  { %s3418_s20 = smov [#allocation6]  }
   0xe   :  { %21 = dma.hbm_to_smem %s4480_s0, 16, %s3418_s20, [#allocation5] }
   0xf   :  { %3356 = dma.done.wait [#allocation5], 16 }
  0x10   :  { %3357 = vsyncadd [#allocation5], 4294967280 }
  0x11   :  { %23 = sfence }
  0x12   :  { %24 = vsyncpa [#allocation8], 0 }
  0x13   :  { %25 = vsyncpa [#allocation11], 0 }
  0x14   :  { %26 = vsyncpa [#allocation14], 0 }
  0x15   :  { %27 = vsyncpa [#allocation17], 0 }
  0x16   :  { %29 = vsyncpa [#allocation17 + $0x1], 0 }
  0x17   :  { %30 = vsyncpa [#allocation9], 0 }
  0x18   :  { %32 = vsyncpa [#allocation9 + $0x1], 0 }
  0x19   :  { %33 = vsyncpa [#allocation20], 0 }
  0x1a   :  { %34 = vsyncpa [#allocation23], 0  ;;  %s3535_s23 = smov 0   ;;  %s3537_s24 = smov 0  }
  0x1b   :  { %s3539_s25 = smov 0   ;;  %s3541_s26 = smov 0  }
  0x1c LB: > { %4520 = sst [smem:[#allocation58_spill]] %s3404_s23  ;;  %s3556_s0 = sadd.s32 4294967295, %s3416_s26   ;;  %s3416_s26 = sphi %s3541_s26, %s4576_s26   ;;  %s3412_s25 = sphi %s3539_s25, %s4575_s25   ;;  %s3408_s24 = sphi %s3537_s24, %s4574_s24   ;;  %s3404_s23 = sphi %s3535_s23, %s4573_s23  }
  0x1d   : > { %4521 = sst [smem:[#allocation59_spill]] %s3412_s25  ;;  %s2335_s27 = sadd.s32 4294967294, %s3416_s26  }
  0x1e   : > { %p207_p3 = scmp.ne.s32.totalorder %s3408_s24, %s3404_s23  ;;  %p4498_p4 = scmp.eq.s32.totalorder %s3556_s0, 0 }
  0x1f   : > { %p263_p6 = scmp.eq.s32.totalorder %s2335_s27, 3  ;;  %p2336_p8 = scmp.ge.s32.totalorder %s3416_s26, 1 }
  0x20   : > { %p3565_p7 = por %p4498_p4, %p207_p3  ;;  %p333_p10 = scmp.lt.s32.totalorder %s3416_s26, 5 }
  0x21   : > { %p3570_p9 = por %p263_p6, %p207_p3  ;;  %s3419_s15 = smov [#allocation10]  }
  0x22   : > { %s4522_s28 = scalar_select %p3565_p7, 1, 0 }
  0x23   : > { %s4523_s29 = scalar_select %p3570_p9, 1, 0 }
  0x24   : > { %p3576_p12 = pnand %p2336_p8, %p333_p10  ;;  %s356_s16 = sshll.u32 %s3419_s15, 4  ;;  %s3580_s16 = int_to_ptr.vmem [resolvable:$true] %s356_s16 }
  0x25   : > { %4524 = sst [smem:[#allocation60_spill]] %s4523_s29  ;;  %s3420_s18 = smov [#allocation13]  }
  0x26   : > { %s4525_s30 = scalar_select %p3576_p12, 1, 0 }
  0x27   : > { %p2711_p13 = pneg %p3576_p12  ;;  %s382_s19 = sshll.u32 %s3420_s18, 4  ;;  %s3590_s19 = int_to_ptr.vmem [resolvable:$true] %s382_s19 }
  0x28   : > { %s3421_s20 = smov [#allocation7]   ;;  %s4527_s3 = sld [smem:[#allocation63_spill]] }
  0x29   : > { %p3586_p0 = pnand %p2711_p13, %p4498_p4  ;;  %s3592_s21 = sshll.u32 %s3421_s20, 4  ;;  %s347_s21 = int_to_ptr.vmem [resolvable:$true] %s3592_s21 }
  0x2b   : > { %p3602_p2 = pneg %p3586_p0 }
  0x2e   : > { %s2872_s15 = scalar_lea.hbm %s4527_s3, 2048 }
  0x2f   : > { %p2873_p1 = scmp.ne.s32.totalorder %s4527_s3, %s2872_s15  ;;  %p2879_p8 = scmp.lt.u32.totalorder %s2872_s15, %s4527_s3 }
  0x31   : > { %p2875_p3 = pnand %p3602_p2, %p2873_p1 }
  0x33   : > { %p2876_p6 = pneg %p2875_p3 }
  0x35   : > { %p2881_p10 = pnand %p2879_p8, %p2876_p6 }
  0x37   : > { %2884 = shalt.err (!%p2881_p10)
}
  0x38   : > { %s2885_s23 = scalar_lea.vmem %s3580_s16, 2048  ;;  %p2893_p5 = scmp.lt.s32.totalorder %s3580_s16, %s3580_s16 }
  0x39   : > { %p2886_p13 = scmp.ne.s32.totalorder %s3580_s16, %s2885_s23  ;;  %p2894_p9 = scmp.lt.s32.totalorder %s2885_s23, %s2885_s23 }
  0x3b   : > { %p2888_p11 = pnand %p2886_p13, %p3602_p2  ;;  %p2895_p1 = por %p2894_p9, %p2893_p5 }
  0x3d   : > { %p2889_p4 = pneg %p2888_p11 }
  0x3f   : > { %p2896_p3 = pnand %p2895_p1, %p2889_p4 }
  0x41   : > { %2899 = shalt.err (!%p2896_p3)
}
  0x42   : > { %s4504_s29 = smov 128   ;;  %s3423_s22 = smov 8  }
  0x43   : > { %2717 = dma.hbm_to_vmem [thread:$0]  (!%p3586_p0), %s4527_s3, 2048, %s3580_s16, [#allocation11], %s4504_s29, %s4504_s29, %s3423_s22  }
  0x44   : > { %s4529_s5 = sld [smem:[#allocation65_spill]] }
  0x4a   : > { %s2900_s23 = scalar_lea.hbm %s4529_s5, 2048 }
  0x4b   : > { %p2901_p4 = scmp.ne.s32.totalorder %s4529_s5, %s2900_s23  ;;  %p2907_p11 = scmp.lt.u32.totalorder %s2900_s23, %s4529_s5 }
  0x4d   : > { %p2903_p5 = pnand %p2901_p4, %p3602_p2 }
  0x4f   : > { %p2904_p9 = pneg %p2903_p5 }
  0x51   : > { %p2909_p6 = pnand %p2907_p11, %p2904_p9 }
  0x53   : > { %2912 = shalt.err (!%p2909_p6)
}
  0x54   : > { %s2913_s16 = scalar_lea.vmem %s3590_s19, 2048  ;;  %p2921_p1 = scmp.lt.s32.totalorder %s3590_s19, %s3590_s19 }
  0x55   : > { %p2914_p8 = scmp.ne.s32.totalorder %s3590_s19, %s2913_s16  ;;  %p2922_p3 = scmp.lt.s32.totalorder %s2913_s16, %s2913_s16 }
  0x57   : > { %p2916_p10 = pnand %p2914_p8, %p3602_p2  ;;  %p2923_p4 = por %p2922_p3, %p2921_p1 }
  0x59   : > { %p2917_p13 = pneg %p2916_p10 }
  0x5b   : > { %p2924_p5 = pnand %p2923_p4, %p2917_p13 }
  0x5d   : > { %2927 = shalt.err (!%p2924_p5)
}
  0x5e   : > { %2723 = dma.hbm_to_vmem [thread:$0]  (!%p3586_p0), %s4529_s5, 2048, %s3590_s19, [#allocation14], %s4504_s29, %s4504_s29, %s3423_s22  }
  0x5f   : > { %s4530_s2 = sld [smem:[#allocation62_spill]] }
  0x65   : > { %s2928_s27 = scalar_lea.hbm %s4530_s2, 128 }
  0x66   : > { %p2929_p9 = scmp.ne.s32.totalorder %s4530_s2, %s2928_s27  ;;  %p2935_p8 = scmp.lt.u32.totalorder %s2928_s27, %s4530_s2 }
  0x68   : > { %p2931_p11 = pnand %p2929_p9, %p3602_p2 }
  0x6a   : > { %p2932_p6 = pneg %p2931_p11 }
  0x6c   : > { %p2937_p10 = pnand %p2935_p8, %p2932_p6 }
  0x6e   : > { %2940 = shalt.err (!%p2937_p10)
}
  0x6f   : > { %s2941_s16 = scalar_lea.vmem %s347_s21, 128  ;;  %p2949_p4 = scmp.lt.s32.totalorder %s347_s21, %s347_s21 }
  0x70   : > { %p2942_p13 = scmp.ne.s32.totalorder %s347_s21, %s2941_s16  ;;  %p2950_p5 = scmp.lt.s32.totalorder %s2941_s16, %s2941_s16 }
  0x72   : > { %p2944_p1 = pnand %p2942_p13, %p3602_p2  ;;  %p2951_p7 = por %p2950_p5, %p2949_p4 }
  0x74   : > { %p2945_p3 = pneg %p2944_p1 }
  0x76   : > { %p2952_p12 = pnand %p2951_p7, %p2945_p3 }
  0x78   : > { %2955 = shalt.err (!%p2952_p12)
}
  0x79   : > { %2714 = dma.hbm_to_vmem [thread:$0]  (!%p3586_p0), %s4530_s2, 128, %s347_s21, [#allocation8]  }
  0x7a   : > { %s3424_s12 = smov [#allocation12]   ;;  %s3425_s14 = smov [#allocation15]  }
  0x7b   : > { %s369_s13 = sshll.u32 %s3424_s12, 4  ;;  %s398_s27 = sshll.u32 %s3425_s14, 4  ;;  %s370_s13 = int_to_ptr.vmem [resolvable:$true] %s369_s13  ;;  %s399_s27 = int_to_ptr.vmem [resolvable:$true] %s398_s27 }
  0x7c   : > { %s4531_s4 = sld [smem:[#allocation64_spill]] }
  0x82   : > { %s2956_s20 = scalar_lea.hbm %s4531_s4, 2048 }
  0x83   : > { %p2957_p7 = scmp.ne.s32.totalorder %s4531_s4, %s2956_s20  ;;  %p2963_p11 = scmp.lt.u32.totalorder %s2956_s20, %s4531_s4 }
  0x85   : > { %p2959_p12 = pnand %p2957_p7, %p3602_p2 }
  0x87   : > { %p2960_p9 = pneg %p2959_p12 }
  0x89   : > { %p2965_p6 = pnand %p2963_p11, %p2960_p9 }
  0x8b   : > { %2968 = shalt.err (!%p2965_p6)
}
  0x8c   : > { %s2969_s21 = scalar_lea.vmem %s370_s13, 2048  ;;  %p2977_p1 = scmp.lt.s32.totalorder %s370_s13, %s370_s13 }
  0x8d   : > { %p2970_p8 = scmp.ne.s32.totalorder %s370_s13, %s2969_s21  ;;  %p2978_p3 = scmp.lt.s32.totalorder %s2969_s21, %s2969_s21 }
  0x8f   : > { %p2972_p10 = pnand %p2970_p8, %p3602_p2  ;;  %p2979_p4 = por %p2978_p3, %p2977_p1 }
  0x91   : > { %p2973_p13 = pneg %p2972_p10 }
  0x93   : > { %p2980_p5 = pnand %p2979_p4, %p2973_p13 }
  0x95   : > { %2983 = shalt.err (!%p2980_p5)
}
  0x96   : > { %s4532_s8 = smov 128   ;;  %s4533_s7 = sld [smem:[#allocation66_spill]] }
  0x97   : > { %2720 = dma.hbm_to_vmem [thread:$0]  (!%p3586_p0), %s4531_s4, 2048, %s370_s13, [#allocation11], %s4532_s8, %s4532_s8, %s3423_s22  }
  0x9c   : > { %s2984_s18 = scalar_lea.hbm %s4533_s7, 8192 }
  0x9d   : > { %p2985_p7 = scmp.ne.s32.totalorder %s4533_s7, %s2984_s18  ;;  %p2991_p11 = scmp.lt.u32.totalorder %s2984_s18, %s4533_s7 }
  0x9f   : > { %p2987_p12 = pnand %p2985_p7, %p3602_p2 }
  0xa1   : > { %p2988_p9 = pneg %p2987_p12 }
  0xa3   : > { %p2993_p6 = pnand %p2991_p11, %p2988_p9 }
  0xa5   : > { %2996 = shalt.err (!%p2993_p6)
}
  0xa6   : > { %s2997_s21 = scalar_lea.vmem %s399_s27, 8192  ;;  %p3005_p1 = scmp.lt.s32.totalorder %s399_s27, %s399_s27 }
  0xa7   : > { %p2998_p8 = scmp.ne.s32.totalorder %s399_s27, %s2997_s21  ;;  %p3006_p3 = scmp.lt.s32.totalorder %s2997_s21, %s2997_s21 }
  0xa9   : > { %p3000_p10 = pnand %p2998_p8, %p3602_p2  ;;  %p3007_p4 = por %p3006_p3, %p3005_p1 }
  0xab   : > { %p3001_p13 = pneg %p3000_p10 }
  0xad   : > { %p3008_p5 = pnand %p3007_p4, %p3001_p13 }
  0xaf   : > { %3011 = shalt.err (!%p3008_p5)
}
  0xb0   : > { %s3426_s22 = smov 512   ;;  %s3427_s11 = smov 32  }
  0xb1   : > { %2726 = dma.hbm_to_vmem [thread:$0]  (!%p3586_p0), %s4533_s7, 8192, %s399_s27, [#allocation14], %s3426_s22, %s3426_s22, %s3427_s11  }
  0xb2   : > { %s3714_s29 = sadd.s32 1, %s3416_s26   ;;  %s194_s14 = sadd.s32 1, %s3412_s25 }
  0xb3   : > { %s191_s12 = ssub.s32 %s3416_s26, %s3714_s29  ;;  %p201_p7 = scmp.ne.s32.totalorder %s3412_s25, %s3408_s24 }
  0xb4   : > { %p192_p2 = scmp.eq.s32.totalorder %s191_s12, 0  ;;  %p202_p12 = scmp.eq.s32.totalorder %s3416_s26, 0 }
  0xb5   : > { %p2740_p9 = scmp.lt.s32.totalorder %s3416_s26, 4  ;;  %p4535_p6 = scmp.eq.s32.totalorder %s3556_s0, 3 }
  0xb6   : > { %s3724_s15 = scalar_select %p192_p2, %s3412_s25, %s194_s14  }
  0xb7   : > { %p203_p11 = por %p202_p12, %p201_p7  ;;  %p3728_p8 = por %p4535_p6, %p201_p7 }
  0xb8   : > { %4534 = sst [smem:[#allocation61_spill]] %s3724_s15  ;;  %s415_s18 = sand.u32 1, %s3412_s25  }
  0xb9   : > { %s2393_s20 = sshll.u32 %s3416_s26, 9  ;;  %s2343_s27 = sshll.u32 %s415_s18, 9 }
  0xba   : > { %s4537_s9 = sld [smem:[#allocation68_spill]]  ;;  %s419_s21 = scalar_lea.vmem [#allocation16], %s2343_s27 }
  0xbb   : > { %s426_s13 = sshll.u32 %s419_s21, 4  ;;  %p3739_p0 = pnand %p2740_p9, %p203_p11  ;;  %s3743_s13 = int_to_ptr.vmem [resolvable:$true] %s426_s13 }
  0xbc   : > { %s3745_s12 = scalar_lea.sflag [#allocation17], %s415_s18 }
  0xbd   : > { %p3014_p13 = pneg %p3739_p0 }
  0xc0   : > { %s3737_s19 = scalar_lea.hbm %s4537_s9, %s2393_s20  ;;  %s3017_s23 = scalar_lea.hbm %s4537_s9, 32768 }
  0xc1   : > { %s3012_s14 = scalar_lea.hbm %s3737_s19, 8192  ;;  %p3018_p4 = scmp.lt.u32.totalorder %s3737_s19, %s4537_s9 }
  0xc2   : > { %p3013_p10 = scmp.ne.s32.totalorder %s3737_s19, %s3012_s14  ;;  %p3019_p5 = scmp.lt.u32.totalorder %s3017_s23, %s3012_s14 }
  0xc3   : > { %p3021_p7 = scmp.lt.u32.totalorder %s3012_s14, %s3737_s19 }
  0xc4   : > { %p3015_p1 = pnand %p3014_p13, %p3013_p10  ;;  %p3020_p2 = por %p3019_p5, %p3018_p4 }
  0xc6   : > { %p3016_p3 = pneg %p3015_p1  ;;  %p3022_p12 = por %p3021_p7, %p3020_p2 }
  0xc8   : > { %p3023_p9 = pnand %p3022_p12, %p3016_p3 }
  0xca   : > { %3026 = shalt.err (!%p3023_p9)
}
  0xcb   : > { %s3027_s18 = scalar_lea.vmem %s3743_s13, 8192  ;;  %s3428_s20 = smov [#allocation16]  }
  0xcc   : > { %p3028_p11 = scmp.ne.s32.totalorder %s3743_s13, %s3027_s18  ;;  %s3032_s27 = sshll.u32 %s3428_s20, 4  ;;  %s3033_s27 = int_to_ptr.vmem [resolvable:$false] %s3032_s27 }
  0xcd   : > { %s3034_s16 = scalar_lea.vmem %s3033_s27, 16384  ;;  %p3035_p1 = scmp.lt.s32.totalorder %s3743_s13, %s3033_s27 }
  0xce   : > { %p3030_p6 = pnand %p3028_p11, %p3014_p13  ;;  %p3036_p4 = scmp.lt.s32.totalorder %s3034_s16, %s3027_s18 }
  0xd0   : > { %p3031_p10 = pneg %p3030_p6  ;;  %p3037_p5 = por %p3036_p4, %p3035_p1 }
  0xd2   : > { %p3038_p2 = pnand %p3037_p5, %p3031_p10 }
  0xd4   : > { %3041 = shalt.err (!%p3038_p2)
}
  0xd5   : > { %s3429_s14 = smov 2048   ;;  %p4539_p13 = scmp.ne.s32.totalorder %s4525_s30, 0 }
  0xd6   : > { %2730 = dma.hbm_to_vmem [thread:$0]  (!%p3739_p0), %s3737_s19, 8192, %s3743_s13, %s3745_s12, %s3429_s14, %s3426_s22, %s3427_s11  }
  0xd7   : > { %446 = sbr.rel (%p4539_p13) target bundleno = 2056 (0x808), region = 56  ;;  %p4540_p3 = scmp.eq.s32.totalorder (!%p4539_p13), %s3556_s0, 0 }
  0xde   : > { %3359 = dma.done.wait (%p4540_p3), [#allocation8], 128   ;;  %p4541_p7 = pmov %p4540_p3 }
  0xdf   : > { %p4542_p12 = pmov %p4540_p3 }
  0xe0   : > { %3361 = vsyncadd (%p4541_p7), [#allocation8], 4294967168 }
  0xe1   : > { %3363 = dma.done.wait (%p4542_p12), [#allocation11], 4096   ;;  %p4543_p9 = pmov %p4540_p3 }
  0xe2   : > { %p4544_p11 = pmov %p4540_p3 }
  0xe3   : > { %3365 = vsyncadd (%p4543_p9), [#allocation11], 4294963200 }
  0xe4   : > { %3367 = dma.done.wait (%p4544_p11), [#allocation14], 10240   ;;  %p4545_p0 = pmov %p4540_p3 }
  0xe5   : > { %s3790_s30 = sand.u32 1, %s3408_s24   ;;  %p4546_p6 = scmp.ne.s32.totalorder %s4522_s28, 0 }
  0xe6   : > { %3369 = vsyncadd (%p4545_p0), [#allocation14], 4294957056  ;;  %s2352_s22 = sshll.u32 %s3790_s30, 9  ;;  %s469_s11 = scalar_lea.sflag [#allocation17], %s3790_s30 }
  0xe7   : > { %s3794_s19 = scalar_lea.vmem [#allocation16], %s2352_s22 }
  0xe8   : > { %3371 = dma.done.wait (%p4546_p6), %s469_s11, 8192  }
  0xe9   : > { %3373 = vsyncadd (%p4546_p6), %s469_s11, 4294959104  ;;  %s2353_s13 = sshll.u32 %s3790_s30, 5  ;;  %s2354_s8 = sshll.u32 %s3556_s0, 2 }
  0xea   : > { %p519_p10 = scmp.lt.s32.totalorder %s2354_s8, 15  ;;  %s3808_s18 = scalar_lea.vmem [#allocation18], %s2353_s13 }
  0xeb   : > { %p4547_p1 = scmp.ne.s32.totalorder %s3556_s0, 0 }
  0xec   : > { %s4578_s8 = smov (!%p519_p10, %s2354_s8), 15  ;;  %s528_s20 = sld [smem:[#allocation6]] (!%p4547_p1) }
  0xed   : > { %527 = sbr.rel (%p4547_p1) target bundleno = 1782 (0x6f6), region = 84  ;;  %s3430_s28 = smov (!%p4547_p1), [#allocation2]  }
  0xee   : > { %s538_s27 = sshll.u32 (!%p4547_p1), %s3430_s28, 4  ;;  %s3812_s16 = sld [smem:[#allocation6 + $0x1]] (!%p4547_p1)  ;;  %s3814_s27 = int_to_ptr.vmem [resolvable:$true] %s538_s27 }
  0xef   : > { %s3431_s14 = smov (!%p4547_p1), [#allocation2 + $0x1]   ;;  %s3816_s11 = sld [smem:[#allocation6 + $0x2]] (!%p4547_p1) }
  0xf0   : > { %s554_s22 = sshll.u32 (!%p4547_p1), %s3431_s14, 4  ;;  %s3432_s12 = smov (!%p4547_p1), [#allocation2 + $0x2]   ;;  %s3818_s22 = int_to_ptr.vmem [resolvable:$true] %s554_s22 }
  0xf1   : > { %s570_s13 = sshll.u32 (!%p4547_p1), %s3432_s12, 4  ;;  %s3820_s23 = sld [smem:[#allocation6 + $0x3]] (!%p4547_p1)  ;;  %s3822_s13 = int_to_ptr.vmem [resolvable:$true] %s570_s13 }
  0xf2   : > { %s2356_s21 = sshll.u32 (!%p4547_p1), %s528_s20, 4  ;;  %s3831_s9 = scalar_lea.hbm (!%p4547_p1), %s4481_s1, 32768 }
  0xf3   : > { %s530_s3 = scalar_lea.hbm (!%p4547_p1), %s4481_s1, %s2356_s21 }
  0xf4   : > { %s2358_s4 = sshll.u32 %s3812_s16, 4  ;;  %s3042_s5 = scalar_lea.hbm %s530_s3, 16 }
  0xf5   : > { %p3043_p4 = scmp.ne.s32.totalorder %s530_s3, %s3042_s5  ;;  %p3045_p5 = scmp.lt.u32.totalorder %s530_s3, %s4481_s1 }
  0xf6   : > { %p3046_p2 = scmp.lt.u32.totalorder %s3831_s9, %s3042_s5  ;;  %p3048_p3 = scmp.lt.u32.totalorder %s3042_s5, %s530_s3 }
  0xf8   : > { %p3047_p13 = por %p3046_p2, %p3045_p5 }
  0xfa   : > { %p3049_p7 = por %p3048_p3, %p3047_p13 }
  0xfc   : > { %p3050_p12 = pnand %p3049_p7, %p3043_p4 }
  0xfe   : > { %3053 = shalt.err (!%p3050_p12)  }
  0xff   : > { %s3054_s2 = scalar_lea.vmem %s3814_s27, 16  ;;  %s3840_s7 = scalar_lea.vmem %s3814_s27, 128 }
 0x100   : > { %p3055_p9 = scmp.ne.s32.totalorder %s3814_s27, %s3054_s2  ;;  %p3059_p11 = scmp.lt.s32.totalorder %s3814_s27, %s3814_s27 }
 0x101   : > { %p3060_p0 = scmp.lt.s32.totalorder %s3840_s7, %s3054_s2 }
 0x103   : > { %p3061_p6 = por %p3060_p0, %p3059_p11 }
 0x105   : > { %p3062_p10 = pnand %p3061_p6, %p3055_p9 }
 0x107   : > { %3065 = shalt.err (!%p3062_p10)  }
 0x108   : > { %541 = dma.hbm_to_vmem [thread:$0]  %s530_s3, 16, %s3814_s27, [#allocation4] }
 0x109   : > { %s544_s15 = scalar_lea.hbm %s4481_s1, %s2358_s4  ;;  %s2360_s21 = sshll.u32 %s3816_s11, 4 }
 0x10a   : > { %s3066_s20 = scalar_lea.hbm %s544_s15, 16  ;;  %p3069_p4 = scmp.lt.u32.totalorder %s544_s15, %s4481_s1 }
 0x10b   : > { %p3067_p1 = scmp.ne.s32.totalorder %s544_s15, %s3066_s20  ;;  %p3070_p5 = scmp.lt.u32.totalorder %s3831_s9, %s3066_s20 }
 0x10c   : > { %p3072_p13 = scmp.lt.u32.totalorder %s3066_s20, %s544_s15 }
 0x10d   : > { %p3071_p2 = por %p3070_p5, %p3069_p4 }
 0x10f   : > { %p3073_p3 = por %p3072_p13, %p3071_p2 }
 0x111   : > { %p3074_p7 = pnand %p3073_p3, %p3067_p1 }
 0x113   : > { %3077 = shalt.err (!%p3074_p7)  }
 0x114   : > { %s3078_s3 = scalar_lea.vmem %s3818_s22, 16  ;;  %p3083_p9 = scmp.lt.s32.totalorder %s3818_s22, %s3814_s27 }
 0x115   : > { %p3079_p12 = scmp.ne.s32.totalorder %s3818_s22, %s3078_s3  ;;  %p3084_p11 = scmp.lt.s32.totalorder %s3840_s7, %s3078_s3 }
 0x117   : > { %p3085_p0 = por %p3084_p11, %p3083_p9 }
 0x119   : > { %p3086_p6 = pnand %p3085_p0, %p3079_p12 }
 0x11b   : > { %3089 = shalt.err (!%p3086_p6)  }
 0x11c   : > { %557 = dma.hbm_to_vmem [thread:$0]  %s544_s15, 16, %s3818_s22, [#allocation4 + $0x1] }
 0x11d   : > { %s560_s28 = scalar_lea.hbm %s4481_s1, %s2360_s21  ;;  %s2362_s14 = sshll.u32 %s3820_s23, 4 }
 0x11e   : > { %s3090_s2 = scalar_lea.hbm %s560_s28, 16  ;;  %p3093_p1 = scmp.lt.u32.totalorder %s560_s28, %s4481_s1 }
 0x11f   : > { %p3091_p10 = scmp.ne.s32.totalorder %s560_s28, %s3090_s2  ;;  %p3094_p4 = scmp.lt.u32.totalorder %s3831_s9, %s3090_s2 }
 0x120   : > { %p3096_p2 = scmp.lt.u32.totalorder %s3090_s2, %s560_s28 }
 0x121   : > { %p3095_p5 = por %p3094_p4, %p3093_p1 }
 0x123   : > { %p3097_p13 = por %p3096_p2, %p3095_p5 }
 0x125   : > { %p3098_p3 = pnand %p3097_p13, %p3091_p10 }
 0x127   : > { %3101 = shalt.err (!%p3098_p3)  }
 0x128   : > { %s3102_s22 = scalar_lea.vmem %s3822_s13, 16  ;;  %p3107_p12 = scmp.lt.s32.totalorder %s3822_s13, %s3814_s27 }
 0x129   : > { %p3103_p7 = scmp.ne.s32.totalorder %s3822_s13, %s3102_s22  ;;  %p3108_p9 = scmp.lt.s32.totalorder %s3840_s7, %s3102_s22 }
 0x12b   : > { %p3109_p11 = por %p3108_p9, %p3107_p12 }
 0x12d   : > { %p3110_p0 = pnand %p3109_p11, %p3103_p7 }
 0x12f   : > { %3113 = shalt.err (!%p3110_p0)  }
 0x130   : > { %573 = dma.hbm_to_vmem [thread:$0]  %s560_s28, 16, %s3822_s13, [#allocation4 + $0x2] }
 0x131   : > { %s576_s21 = scalar_lea.hbm %s4481_s1, %s2362_s14  ;;  %s3433_s20 = smov [#allocation2 + $0x3]  }
 0x132   : > { %s586_s16 = sshll.u32 %s3433_s20, 4  ;;  %s3877_s12 = sld [smem:[#allocation6 + $0x4]]  ;;  %s587_s16 = int_to_ptr.vmem [resolvable:$true] %s586_s16 }
 0x133   : > { %s3114_s3 = scalar_lea.hbm %s576_s21, 16  ;;  %p3117_p10 = scmp.lt.u32.totalorder %s576_s21, %s4481_s1 }
 0x134   : > { %p3115_p6 = scmp.ne.s32.totalorder %s576_s21, %s3114_s3  ;;  %p3118_p1 = scmp.lt.u32.totalorder %s3831_s9, %s3114_s3 }
 0x135   : > { %p3120_p5 = scmp.lt.u32.totalorder %s3114_s3, %s576_s21 }
 0x136   : > { %p3119_p4 = por %p3118_p1, %p3117_p10 }
 0x138   : > { %p3121_p2 = por %p3120_p5, %p3119_p4 }
 0x13a   : > { %p3122_p13 = pnand %p3121_p2, %p3115_p6 }
 0x13c   : > { %3125 = shalt.err (!%p3122_p13)  }
 0x13d   : > { %s3126_s13 = scalar_lea.vmem %s587_s16, 16  ;;  %p3131_p7 = scmp.lt.s32.totalorder %s587_s16, %s3814_s27 }
 0x13e   : > { %p3127_p3 = scmp.ne.s32.totalorder %s587_s16, %s3126_s13  ;;  %p3132_p12 = scmp.lt.s32.totalorder %s3840_s7, %s3126_s13 }
 0x140   : > { %p3133_p9 = por %p3132_p12, %p3131_p7 }
 0x142   : > { %p3134_p11 = pnand %p3133_p9, %p3127_p3 }
 0x144   : > { %3137 = shalt.err (!%p3134_p11)  }
 0x145   : > { %589 = dma.hbm_to_vmem [thread:$0]  %s576_s21, 16, %s587_s16, [#allocation4 + $0x3] }
 0x146   : > { %s3434_s28 = smov [#allocation2 + $0x4]   ;;  %s3885_s2 = sld [smem:[#allocation6 + $0x5]] }
 0x147   : > { %s602_s14 = sshll.u32 %s3434_s28, 4  ;;  %s3435_s5 = smov [#allocation2 + $0x5]   ;;  %s603_s14 = int_to_ptr.vmem [resolvable:$true] %s602_s14 }
 0x148   : > { %s618_s25 = sshll.u32 %s3435_s5, 4  ;;  %s3887_s22 = sld [smem:[#allocation6 + $0x6]]  ;;  %s3890_s25 = int_to_ptr.vmem [resolvable:$true] %s618_s25 }
 0x149   : > { %s2364_s23 = sshll.u32 %s3877_s12, 4 }
 0x14a   : > { %s592_s3 = scalar_lea.hbm %s4481_s1, %s2364_s23 }
 0x14b   : > { %s3138_s4 = scalar_lea.hbm %s592_s3, 16  ;;  %p3141_p6 = scmp.lt.u32.totalorder %s592_s3, %s4481_s1 }
 0x14c   : > { %p3139_p0 = scmp.ne.s32.totalorder %s592_s3, %s3138_s4  ;;  %p3142_p10 = scmp.lt.u32.totalorder %s3831_s9, %s3138_s4 }
 0x14d   : > { %p3144_p4 = scmp.lt.u32.totalorder %s3138_s4, %s592_s3 }
 0x14e   : > { %p3143_p1 = por %p3142_p10, %p3141_p6 }
 0x150   : > { %p3145_p5 = por %p3144_p4, %p3143_p1 }
 0x152   : > { %p3146_p2 = pnand %p3145_p5, %p3139_p0 }
 0x154   : > { %3149 = shalt.err (!%p3146_p2)  }
 0x155   : > { %s3150_s11 = scalar_lea.vmem %s603_s14, 16  ;;  %p3155_p3 = scmp.lt.s32.totalorder %s603_s14, %s3814_s27 }
 0x156   : > { %p3151_p13 = scmp.ne.s32.totalorder %s603_s14, %s3150_s11  ;;  %p3156_p7 = scmp.lt.s32.totalorder %s3840_s7, %s3150_s11 }
 0x158   : > { %p3157_p12 = por %p3156_p7, %p3155_p3 }
 0x15a   : > { %p3158_p9 = pnand %p3157_p12, %p3151_p13 }
 0x15c   : > { %3161 = shalt.err (!%p3158_p9)  }
 0x15d   : > { %605 = dma.hbm_to_vmem [thread:$0]  %s592_s3, 16, %s603_s14, [#allocation4 + $0x4] }
 0x15e   : > { %s2366_s12 = sshll.u32 %s3885_s2, 4  ;;  %s3436_s13 = smov [#allocation2 + $0x6]  }
 0x15f   : > { %s634_s28 = sshll.u32 %s3436_s13, 4  ;;  %s608_s15 = scalar_lea.hbm %s4481_s1, %s2366_s12  ;;  %s3905_s28 = int_to_ptr.vmem [resolvable:$true] %s634_s28 }
 0x160   : > { %s3162_s20 = scalar_lea.hbm %s608_s15, 16  ;;  %p3165_p0 = scmp.lt.u32.totalorder %s608_s15, %s4481_s1 }
 0x161   : > { %p3163_p11 = scmp.ne.s32.totalorder %s608_s15, %s3162_s20  ;;  %p3166_p6 = scmp.lt.u32.totalorder %s3831_s9, %s3162_s20 }
 0x162   : > { %p3168_p1 = scmp.lt.u32.totalorder %s3162_s20, %s608_s15 }
 0x163   : > { %p3167_p10 = por %p3166_p6, %p3165_p0 }
 0x165   : > { %p3169_p4 = por %p3168_p1, %p3167_p10 }
 0x167   : > { %p3170_p5 = pnand %p3169_p4, %p3163_p11 }
 0x169   : > { %3173 = shalt.err (!%p3170_p5)  }
 0x16a   : > { %s3174_s14 = scalar_lea.vmem %s3890_s25, 16  ;;  %p3179_p13 = scmp.lt.s32.totalorder %s3890_s25, %s3814_s27 }
 0x16b   : > { %p3175_p2 = scmp.ne.s32.totalorder %s3890_s25, %s3174_s14  ;;  %p3180_p3 = scmp.lt.s32.totalorder %s3840_s7, %s3174_s14 }
 0x16d   : > { %p3181_p7 = por %p3180_p3, %p3179_p13 }
 0x16f   : > { %p3182_p12 = pnand %p3181_p7, %p3175_p2 }
 0x171   : > { %3185 = shalt.err (!%p3182_p12)  }
 0x172   : > { %621 = dma.hbm_to_vmem [thread:$0]  %s608_s15, 16, %s3890_s25, [#allocation4 + $0x5] }
 0x173   : > { %s2368_s2 = sshll.u32 %s3887_s22, 4  ;;  %s2369_s3 = sld [smem:[#allocation6 + $0x7]] }
 0x174   : > { %s624_s12 = scalar_lea.hbm %s4481_s1, %s2368_s2 }
 0x175   : > { %s3186_s13 = scalar_lea.hbm %s624_s12, 16  ;;  %p3189_p11 = scmp.lt.u32.totalorder %s624_s12, %s4481_s1 }
 0x176   : > { %p3187_p9 = scmp.ne.s32.totalorder %s624_s12, %s3186_s13  ;;  %p3190_p0 = scmp.lt.u32.totalorder %s3831_s9, %s3186_s13 }
 0x177   : > { %p3192_p10 = scmp.lt.u32.totalorder %s3186_s13, %s624_s12 }
 0x178   : > { %p3191_p6 = por %p3190_p0, %p3189_p11 }
 0x17a   : > { %p3193_p1 = por %p3192_p10, %p3191_p6 }
 0x17c   : > { %p3194_p4 = pnand %p3193_p1, %p3187_p9 }
 0x17e   : > { %3197 = shalt.err (!%p3194_p4)  }
 0x17f   : > { %s3198_s25 = scalar_lea.vmem %s3905_s28, 16  ;;  %p3203_p2 = scmp.lt.s32.totalorder %s3905_s28, %s3814_s27 }
 0x180   : > { %p3199_p5 = scmp.ne.s32.totalorder %s3905_s28, %s3198_s25  ;;  %p3204_p13 = scmp.lt.s32.totalorder %s3840_s7, %s3198_s25 }
 0x182   : > { %p3205_p3 = por %p3204_p13, %p3203_p2 }
 0x184   : > { %p3206_p7 = pnand %p3205_p3, %p3199_p5 }
 0x186   : > { %3209 = shalt.err (!%p3206_p7)  }
 0x187   : > { %637 = dma.hbm_to_vmem [thread:$0]  %s624_s12, 16, %s3905_s28, [#allocation4 + $0x6] }
 0x188   : > { %s3437_s22 = smov [#allocation2 + $0x7]   ;;  %s2370_s20 = sshll.u32 %s2369_s3, 4 }
 0x189   : > { %s650_s15 = sshll.u32 %s3437_s22, 4  ;;  %s640_s14 = scalar_lea.hbm %s4481_s1, %s2370_s20  ;;  %s651_s15 = int_to_ptr.vmem [resolvable:$true] %s650_s15 }
 0x18a   : > { %s3210_s2 = scalar_lea.hbm %s640_s14, 16  ;;  %p3213_p9 = scmp.lt.u32.totalorder %s640_s14, %s4481_s1 }
 0x18b   : > { %p3211_p12 = scmp.ne.s32.totalorder %s640_s14, %s3210_s2  ;;  %p3214_p11 = scmp.lt.u32.totalorder %s3831_s9, %s3210_s2 }
 0x18c   : > { %p3216_p6 = scmp.lt.u32.totalorder %s3210_s2, %s640_s14 }
 0x18d   : > { %p3215_p0 = por %p3214_p11, %p3213_p9 }
 0x18f   : > { %p3217_p10 = por %p3216_p6, %p3215_p0 }
 0x191   : > { %p3218_p1 = pnand %p3217_p10, %p3211_p12 }
 0x193   : > { %3221 = shalt.err (!%p3218_p1)  }
 0x194   : > { %s3222_s28 = scalar_lea.vmem %s651_s15, 16  ;;  %p3227_p5 = scmp.lt.s32.totalorder %s651_s15, %s3814_s27 }
 0x195   : > { %p3223_p4 = scmp.ne.s32.totalorder %s651_s15, %s3222_s28  ;;  %p3228_p2 = scmp.lt.s32.totalorder %s3840_s7, %s3222_s28 }
 0x197   : > { %p3229_p13 = por %p3228_p2, %p3227_p5 }
 0x199   : > { %p3230_p3 = pnand %p3229_p13, %p3223_p4 }
 0x19b   : > { %3233 = shalt.err (!%p3230_p3)  }
 0x19c   : > { %653 = dma.hbm_to_vmem [thread:$0]  %s640_s14, 16, %s651_s15, [#allocation4 + $0x7] }
 0x19d   : > { %3374 = dma.done.wait [#allocation4], 16 }
 0x19e   : > { %3375 = vsyncadd [#allocation4], 4294967280 }
 0x19f   : > { %3376 = dma.done.wait [#allocation4 + $0x1], 16 }
 0x1a0   : > { %3377 = vsyncadd [#allocation4 + $0x1], 4294967280 }
 0x1a1   : > { %3378 = dma.done.wait [#allocation4 + $0x2], 16 }
 0x1a2   : > { %3379 = vsyncadd [#allocation4 + $0x2], 4294967280 }
 0x1a3   : > { %3380 = dma.done.wait [#allocation4 + $0x3], 16 }
 0x1a4   : > { %3381 = vsyncadd [#allocation4 + $0x3], 4294967280 }
 0x1a5   : > { %3382 = dma.done.wait [#allocation4 + $0x4], 16 }
 0x1a6   : > { %3383 = vsyncadd [#allocation4 + $0x4], 4294967280 }
 0x1a7   : > { %3384 = dma.done.wait [#allocation4 + $0x5], 16 }
 0x1a8   : > { %3385 = vsyncadd [#allocation4 + $0x5], 4294967280 }
 0x1a9   : > { %3386 = dma.done.wait [#allocation4 + $0x6], 16 }
 0x1aa   : > { %3387 = vsyncadd [#allocation4 + $0x6], 4294967280 }
 0x1ab   : > { %3388 = dma.done.wait [#allocation4 + $0x7], 16 }
 0x1ac   : > { %3389 = vsyncadd [#allocation4 + $0x7], 4294967280  ;;  %v693_v0 = vlaneseq  ;;  %v3438_v1 = vmov 1966171168   ;;  %v671_v10 = vld [vmem:[#allocation7] sm:$0xff]  ;;  %v3952_v16 = vld [vmem:[#allocation10] sm:$0xff] }
 0x1ad   : > { %v691_v2 = vunpack.c.l.s4 %v3438_v1  ;;  %v689_v13 = vcombine.high %v671_v10, %v671_v10  ;;  %v3955_v21 = vld [vmem:[#allocation10 + $0x10] sm:$0xff]  ;;  %v3957_v22 = vld [vmem:[#allocation10 + $0x8] sm:$0xff]  ;;  %v3961_v25 = vld [vmem:[#allocation10 + $0x18] sm:$0xff]  ;;  %vm853_vm0 = vcmask 130112   ;;  %vm918_vm1 = vcmask 1041409   ;;  %s4551_s12 = sld [smem:[#allocation67_spill]] }
 0x1ae   : > { %v3940_v3 = vshrl.u32 %v693_v0, 7  ;;  %v843_v4 = vand.u32 127, %v693_v0  ;;  %v3966_v30 = vld [vmem:[#allocation10 + $0x20] sm:$0xff]  ;;  %v3969_v32 = vld [vmem:[#allocation10 + $0x28] sm:$0xff]  ;;  %v3980_v43 = vld [vmem:[#allocation10 + $0x30] sm:$0xff]  ;;  %vm920_vm2 = vcmask 1042434  }
 0x1af   : > { %v692_v5 = vunpack.c.0.s8 %v691_v2  ;;  %v3973_v37 = vld [vmem:[#allocation10 + $0x40] sm:$0xff]  ;;  %v3976_v39 = vld [vmem:[#allocation10 + $0x48] sm:$0xff]  ;;  %v3983_v45 = vld [vmem:[#allocation10 + $0x38] sm:$0xff]  ;;  %vm922_vm3 = vcmask 1043459   ;;  %vm924_vm4 = vcmask 1044484   ;;  %vm926_vm5 = vcmask 1045509  }
 0x1b0   : > { %v3943_v6 = vsub.s32 %v843_v4, %v3940_v3  ;;  %v848_v7 = vadd.s32 4294967288, %v843_v4  ;;  %v3950_v12 = vsub.s32 0, %v3940_v3  ;;  %v3987_v49 = vld [vmem:[#allocation10 + $0x50] sm:$0xff]  ;;  %v3990_v51 = vld [vmem:[#allocation10 + $0x58] sm:$0xff]  ;;  %v3994_v55 = vld [vmem:[#allocation10 + $0x60] sm:$0xff]  ;;  %vm928_vm6 = vcmask 1046534  }
 0x1b1   : > { %v695_v8 = vsub.s32 %v692_v5, %v3940_v3  ;;  %v3997_v57 = vld [vmem:[#allocation10 + $0x68] sm:$0xff]  ;;  %v4001_v60 = vld [vmem:[#allocation10 + $0x70] sm:$0xff]  ;;  %v4004_v62 = vld [vmem:[#allocation10 + $0x78] sm:$0xff]  ;;  %vm930_vm7 = vcmask 1047559   ;;  %vm933_vm8 = vcmask 130048   ;;  %vm3441_vm9 = vmmov 0  }
 0x1b2   : > { %v3947_v9 = vsub.s32 %v848_v7, %v3940_v3 }
 0x1b3   : > { %v696_v11 = vrot.slane %v671_v10, %v695_v8  ;;  %v703_v20 = vrot.slane %v689_v13, %v695_v8 }
 0x1b5   : > { %v712_v14 = vrot.slane %v696_v11, %v695_v8  ;;  %v704_v15 = vcombine.high %v696_v11, %v696_v11  ;;  %v719_v29 = vrot.slane %v703_v20, %v695_v8  ;;  %v705_v36 = vcombine.high %v703_v20, %v703_v20 }
 0x1b7   : > { %v741_v17 = vrot.slane %v712_v14, %v3950_v12  ;;  %v726_v18 = vrot.slane %v704_v15, %v695_v8  ;;  %v734_v19 = vcombine.high %v712_v14, %v712_v14  ;;  %v757_v34 = vrot.slane %v719_v29, %v3950_v12 }
 0x1b8   : > { %v733_v42 = vrot.slane %v705_v36, %v695_v8  ;;  %v735_v48 = vcombine.high %v719_v29, %v719_v29 }
 0x1b9   : > { %v778_v23 = vmul.f32 %v741_v17, %v3952_v16  ;;  %v745_v24 = vrot.slane %v726_v18, %v3950_v12  ;;  %v779_v27 = vmul.f32 %v741_v17, %v3957_v22  ;;  %v749_v28 = vrot.slane %v734_v19, %v3950_v12 }
 0x1ba   : > { %v736_v35 = vcombine.high %v726_v18, %v726_v18  ;;  %v786_v40 = vmul.f32 %v757_v34, %v3973_v37  ;;  %v787_v44 = vmul.f32 %v757_v34, %v3976_v39  ;;  %v761_v47 = vrot.slane %v733_v42, %v3950_v12 }
 0x1bb   : > { %794 = vadd.xlane.f32.xlu0 %v778_v23  ;;  %v780_v26 = vmul.f32 %v745_v24, %v3955_v21  ;;  %v781_v31 = vmul.f32 %v745_v24, %v3961_v25  ;;  %v782_v33 = vmul.f32 %v749_v28, %v3966_v30  ;;  %v783_v38 = vmul.f32 %v749_v28, %v3969_v32 }
 0x1bc   : > { %v753_v41 = vrot.slane %v736_v35, %v3950_v12  ;;  %v788_v52 = vmul.f32 %v761_v47, %v3987_v49  ;;  %v765_v53 = vrot.slane %v735_v48, %v3950_v12  ;;  %v737_v54 = vcombine.high %v733_v42, %v733_v42 }
 0x1bd   : > { %798 = vadd.xlane.f32.xlu1 %v780_v26  ;;  %v789_v56 = vmul.f32 %v761_v47, %v3990_v51 }
 0x1be   : > { %v784_v46 = vmul.f32 %v753_v41, %v3980_v43  ;;  %v785_v50 = vmul.f32 %v753_v41, %v3983_v45  ;;  %v790_v58 = vmul.f32 %v765_v53, %v3994_v55  ;;  %v769_v59 = vrot.slane %v737_v54, %v3950_v12 }
 0x1bf   : > { %796 = vadd.xlane.f32.xlu0 %v779_v27  ;;  %v791_v61 = vmul.f32 %v765_v53, %v3997_v57 }
 0x1c0   : > { %v792_v63 = vmul.f32 %v769_v59, %v4001_v60  ;;  %v793_v0 = vmul.f32 %v769_v59, %v4004_v62 }
 0x1c1   : > { %800 = vadd.xlane.f32.xlu1 %v781_v31 }
 0x1c3   : > { %802 = vadd.xlane.f32.xlu0 %v782_v33 }
 0x1c5   : > { %804 = vadd.xlane.f32.xlu1 %v783_v38 }
 0x1c7   : > { %810 = vadd.xlane.f32.xlu0 %v786_v40 }
 0x1c9   : > { %812 = vadd.xlane.f32.xlu1 %v787_v44 }
 0x1cb   : > { %806 = vadd.xlane.f32.xlu0 %v784_v46 }
 0x1cd   : > { %808 = vadd.xlane.f32.xlu1 %v785_v50 }
 0x1cf   : > { %814 = vadd.xlane.f32.xlu0 %v788_v52 }
 0x1d1   : > { %816 = vadd.xlane.f32.xlu1 %v789_v56 }
 0x1d3   : > { %818 = vadd.xlane.f32.xlu0 %v790_v58 }
 0x1d5   : > { %820 = vadd.xlane.f32.xlu1 %v791_v61 }
 0x1d7   : > { %822 = vadd.xlane.f32.xlu0 %v792_v63 }
 0x1d9   : > { %824 = vadd.xlane.f32.xlu1 %v793_v0 }
 0x248   : > { %v4008_v1 = vpop.xlane.xlu0 %794 }
 0x249   : > { %v847_v28 = vrot.slane %v4008_v1, %v3943_v6 }
 0x24a   : > { %v4010_v2 = vpop.xlane.xlu1 %798 }
 0x24b   : > { %v858_v20 = vrot.slane %v4010_v2, %v3943_v6 }
 0x24c   : > { %v4012_v4 = vpop.xlane.xlu0 %796 }
 0x24d   : > { %v852_v23 = vrot.slane %v4012_v4, %v3947_v9 }
 0x24e   : > { %v4014_v5 = vpop.xlane.xlu1 %800 }
 0x24f   : > { %v862_v15 = vrot.slane %v4014_v5, %v3947_v9  ;;  %v854_v34 = vsel %vm853_vm0, %v852_v23, %v847_v28  ;;  %v3439_v23 = vmov 0  }
 0x250   : > { %v4016_v7 = vpop.xlane.xlu0 %802  ;;  %2814 = vset.pattern.permute.xlu0 %v3439_v23  ;;  %2813 = vset.pattern.permute.xlu1 %v3439_v23 }
 0x251   : > { %v867_v17 = vrot.slane %v4016_v7, %v3943_v6  ;;  %v863_v29 = vsel %vm853_vm0, %v862_v15, %v858_v20 }
 0x252   : > { %v4018_v8 = vpop.xlane.xlu1 %804  ;;  %v919_v40 = vsel %vm918_vm1, %v863_v29, %v854_v34 }
 0x253   : > { %v871_v18 = vrot.slane %v4018_v8, %v3947_v9 }
 0x254   : > { %v4020_v10 = vpop.xlane.xlu0 %810 }
 0x255   : > { %v872_v31 = vsel %vm853_vm0, %v871_v18, %v867_v17  ;;  %v885_v42 = vrot.slane %v4020_v10, %v3943_v6 }
 0x256   : > { %v4022_v11 = vpop.xlane.xlu1 %812  ;;  %v921_v47 = vsel %vm920_vm2, %v872_v31, %v919_v40  ;;  %v4507_v31 = vsub.s32 5, %v3940_v3  ;;  %v4506_v40 = vsub.s32 6, %v3940_v3 }
 0x257   : > { %v889_v41 = vrot.slane %v4022_v11, %v3947_v9 }
 0x258   : > { %v4024_v13 = vpop.xlane.xlu0 %806 }
 0x259   : > { %v876_v26 = vrot.slane %v4024_v13, %v3943_v6  ;;  %v890_v56 = vsel %vm853_vm0, %v889_v41, %v885_v42 }
 0x25a   : > { %v4026_v14 = vpop.xlane.xlu1 %808 }
 0x25b   : > { %v880_v24 = vrot.slane %v4026_v14, %v3947_v9 }
 0x25c   : > { %v4034_v19 = vpop.xlane.xlu0 %814 }
 0x25d   : > { %v881_v35 = vsel %vm853_vm0, %v880_v24, %v876_v26  ;;  %v894_v38 = vrot.slane %v4034_v19, %v3943_v6  ;;  %v4508_v24 = vsub.s32 1, %v3940_v3 }
 0x25e   : > { %v4044_v27 = vpop.xlane.xlu1 %816  ;;  %v923_v50 = vsel %vm922_vm3, %v881_v35, %v921_v47 }
 0x25f   : > { %v898_v36 = vrot.slane %v4044_v27, %v3947_v9  ;;  %v925_v63 = vsel %vm924_vm4, %v890_v56, %v923_v50 }
 0x260   : > { %v4050_v33 = vpop.xlane.xlu0 %818 }
 0x261   : > { %v903_v46 = vrot.slane %v4050_v33, %v3943_v6  ;;  %v899_v53 = vsel %vm853_vm0, %v898_v36, %v894_v38  ;;  %v4096_v36 = vsub.s32 2, %v3940_v3 }
 0x262   : > { %v4063_v44 = vpop.xlane.xlu1 %820  ;;  %v927_v0 = vsel %vm926_vm5, %v899_v53, %v925_v63  ;;  %v4114_v53 = vsub.s32 3, %v3940_v3 }
 0x263   : > { %v907_v48 = vrot.slane %v4063_v44, %v3947_v9 }
 0x264   : > { %v4071_v52 = vpop.xlane.xlu0 %822 }
 0x265   : > { %v912_v54 = vrot.slane %v4071_v52, %v3943_v6  ;;  %v908_v59 = vsel %vm853_vm0, %v907_v48, %v903_v46 }
 0x266   : > { %v4077_v58 = vpop.xlane.xlu1 %824  ;;  %v929_v17 = vsel %vm928_vm6, %v908_v59, %v927_v0 }
 0x267   : > { %v916_v61 = vrot.slane %v4077_v58, %v3947_v9 }
 0x269   : > { %v917_v15 = vsel %vm853_vm0, %v916_v61, %v912_v54 }
 0x26a   : > { %v931_v18 = vsel %vm930_vm7, %v917_v15, %v929_v17 }
 0x26b   : > { %v934_v20 = vsel %vm933_vm8, %v931_v18, -inf }
 0x26c   : > { %935 = vmax.xlane.f32.xlu0 %v934_v20  ;;  %v956_v20 = vsub.s32 4, %v3940_v3 }
 0x2f9   : > { %v936_v26 = vpop.xlane.xlu0 %935 }
 0x2fa   : > { %v941_v28 = vrot.slane %v936_v26, %v3950_v12  ;;  %v945_v29 = vrot.slane %v936_v26, %v4508_v24  ;;  %v4102_v41 = vrot.slane %v936_v26, %v4507_v31  ;;  %v949_v47 = vrot.slane %v936_v26, %v4096_v36 }
 0x2fb   : > { %v953_v63 = vrot.slane %v936_v26, %v4114_v53 }
 0x2fc   : > { %v978_v34 = vsub.f32 %v4008_v1, %v941_v28  ;;  %v979_v35 = vsub.f32 %v4012_v4, %v941_v28  ;;  %v980_v38 = vsub.f32 %v4010_v2, %v945_v29  ;;  %v981_v48 = vsub.f32 %v4014_v5, %v945_v29 }
 0x2fd   : > { %v968_v4 = vsub.s32 7, %v3940_v3  ;;  %v4109_v2 = vrot.slane %v936_v26, %v4506_v40  ;;  %v988_v50 = vsub.f32 %v4034_v19, %v4102_v41  ;;  %v982_v54 = vsub.f32 %v4016_v7, %v949_v47 }
 0x2fe   : > { %v994_v42 = vmul.f32 1.442695, %v978_v34  ;;  %v996_v46 = vmul.f32 1.442695, %v979_v35  ;;  %v998_v1 = vmul.f32 1.442695, %v980_v38  ;;  %v983_v0 = vsub.f32 %v4018_v8, %v949_v47 }
 0x2ff   : > { %v1000_v56 = vmul.f32 1.442695, %v981_v48  ;;  %v969_v5 = vrot.slane %v936_v26, %v968_v4  ;;  %v990_v59 = vsub.f32 %v4050_v33, %v4109_v2  ;;  %v1014_v61 = vmul.f32 1.442695, %v988_v50 }
 0x300   : > { %2816 = vpow2.f32 %v994_v42  ;;  %v1002_v19 = vmul.f32 1.442695, %v982_v54  ;;  %v984_v33 = vsub.f32 %v4024_v13, %v953_v63  ;;  %v1004_v23 = vmul.f32 1.442695, %v983_v0 }
 0x301   : > { %2818 = vpow2.f32 %v996_v46  ;;  %v992_v17 = vsub.f32 %v4071_v52, %v969_v5  ;;  %v1018_v7 = vmul.f32 1.442695, %v990_v59  ;;  %v957_v52 = vrot.slane %v936_v26, %v956_v20 }
 0x302   : > { %2820 = vpow2.f32 %v998_v1  ;;  %v985_v29 = vsub.f32 %v4026_v14, %v953_v63  ;;  %v1006_v34 = vmul.f32 1.442695, %v984_v33  ;;  %v989_v1 = vsub.f32 %v4044_v27, %v4102_v41 }
 0x303   : > { %2822 = vpow2.f32 %v1000_v56  ;;  %v1022_v28 = vmul.f32 1.442695, %v992_v17  ;;  %v986_v38 = vsub.f32 %v4020_v10, %v957_v52  ;;  %v987_v26 = vsub.f32 %v4022_v11, %v957_v52 }
 0x304   : > { %2824 = vpow2.f32 %v1014_v61  ;;  %v1008_v42 = vmul.f32 1.442695, %v985_v29  ;;  %v991_v11 = vsub.f32 %v4063_v44, %v4109_v2  ;;  %v1016_v56 = vmul.f32 1.442695, %v989_v1 }
 0x305   : > { %2826 = vpow2.f32 %v1002_v19  ;;  %v1010_v47 = vmul.f32 1.442695, %v986_v38  ;;  %v1012_v50 = vmul.f32 1.442695, %v987_v26  ;;  %v993_v61 = vsub.f32 %v4077_v58, %v969_v5 }
 0x306   : > { %2828 = vpow2.f32 %v1018_v7  ;;  %v1020_v27 = vmul.f32 1.442695, %v991_v11 }
 0x307   : > { %2830 = vpow2.f32 %v1004_v23  ;;  %v1024_v63 = vmul.f32 1.442695, %v993_v61 }
 0x308   : > { %2832 = vpow2.f32 %v1022_v28 }
 0x309   : > { %2834 = vpow2.f32 %v1006_v34 }
 0x30a   : > { %v4123_v15 = vpop.eup %2816  ;;  %2836 = vpow2.f32 %v1008_v42 }
 0x30b   : > { %v4126_v18 = vpop.eup %2818  ;;  %1043 = vperm.xlu1 %2813, %v4123_v15   ;;  %2838 = vpow2.f32 %v1010_v47 }
 0x30c   : > { %1046 = vperm.xlu0 %2814, %v4126_v18   ;;  %v4132_v8 = vpop.eup %2820  ;;  %2840 = vpow2.f32 %v1012_v50 }
 0x30d   : > { %v4138_v35 = vpop.eup %2822  ;;  %2842 = vpow2.f32 %v1016_v56 }
 0x30e   : > { %v4141_v13 = vpop.eup %2824  ;;  %2844 = vpow2.f32 %v1020_v27 }
 0x30f   : > { %1049 = vperm.xlu1 %2813, %v4132_v8   ;;  %v4145_v46 = vpop.eup %2826  ;;  %2846 = vpow2.f32 %v1024_v63 }
 0x310   : > { %1073 = vperm.xlu0 %2814, %v4141_v13   ;;  %v4148_v14 = vpop.eup %2828 }
 0x311   : > { %v4152_v48 = vpop.eup %2830 }
 0x312   : > { %v4155_v10 = vpop.eup %2832 }
 0x313   : > { %1052 = vperm.xlu1 %2813, %v4138_v35   ;;  %v4160_v54 = vpop.eup %2834 }
 0x314   : > { %1079 = vperm.xlu0 %2814, %v4148_v14   ;;  %v4165_v59 = vpop.eup %2836 }
 0x315   : > { %v4169_v41 = vpop.eup %2838 }
 0x316   : > { %v4172_v0 = vpop.eup %2840 }
 0x317   : > { %1055 = vperm.xlu1 %2813, %v4145_v46   ;;  %v4175_v44 = vpop.eup %2842 }
 0x318   : > { %1085 = vperm.xlu0 %2814, %v4155_v10   ;;  %v4178_v2 = vpop.eup %2844 }
 0x319   : > { %v4181_v58 = vpop.eup %2846 }
 0x31b   : > { %1058 = vperm.xlu1 %2813, %v4152_v48  }
 0x31f   : > { %1061 = vperm.xlu1 %2813, %v4160_v54  }
 0x323   : > { %1064 = vperm.xlu1 %2813, %v4165_v59  }
 0x327   : > { %1067 = vperm.xlu1 %2813, %v4169_v41  }
 0x32b   : > { %1070 = vperm.xlu1 %2813, %v4172_v0  }
 0x32f   : > { %1076 = vperm.xlu1 %2813, %v4175_v44  }
 0x333   : > { %1082 = vperm.xlu1 %2813, %v4178_v2  }
 0x337   : > { %1088 = vperm.xlu1 %2813, %v4181_v58  }
 0x38a   : > { %v1044_v5 = vpop.permute.xlu1 %1043 }
 0x38b   : > { %v1047_v28 = vpop.permute.xlu0 %1046  ;;  %v1093_v11 = vrot.slane %v1044_v5, %v3943_v6 }
 0x38c   : > { %v1097_v50 = vrot.slane %v1047_v28, %v3947_v9 }
 0x38e   : > { %v1050_v19 = vpop.permute.xlu1 %1049  ;;  %v1098_v5 = vsel %vm853_vm0, %v1097_v50, %v1093_v11 }
 0x38f   : > { %v1074_v34 = vpop.permute.xlu0 %1073  ;;  %v1102_v56 = vrot.slane %v1050_v19, %v3943_v6 }
 0x390   : > { %v1138_v19 = vrot.slane %v1074_v34, %v3943_v6 }
 0x392   : > { %v1053_v17 = vpop.permute.xlu1 %1052 }
 0x393   : > { %v1106_v42 = vrot.slane %v1053_v17, %v3947_v9  ;;  %v1080_v26 = vpop.permute.xlu0 %1079 }
 0x395   : > { %v1107_v40 = vsel %vm853_vm0, %v1106_v42, %v1102_v56 }
 0x396   : > { %v1056_v7 = vpop.permute.xlu1 %1055  ;;  %v1162_v42 = vsel %vm918_vm1, %v1107_v40, %v1098_v5 }
 0x397   : > { %v1111_v27 = vrot.slane %v1056_v7, %v3943_v6 }
 0x39a   : > { %v1059_v33 = vpop.permute.xlu1 %1058 }
 0x39b   : > { %v1115_v47 = vrot.slane %v1059_v33, %v3947_v9 }
 0x39d   : > { %v1116_v33 = vsel %vm853_vm0, %v1115_v47, %v1111_v27 }
 0x39e   : > { %v1062_v23 = vpop.permute.xlu1 %1061  ;;  %v1163_v47 = vsel %vm920_vm2, %v1116_v33, %v1162_v42 }
 0x39f   : > { %v1120_v17 = vrot.slane %v1062_v23, %v3943_v6  ;;  %v1086_v23 = vpop.permute.xlu0 %1085 }
 0x3a0   : > { %v1156_v11 = vrot.slane %v1086_v23, %v3943_v6 }
 0x3a2   : > { %v1065_v52 = vpop.permute.xlu1 %1064 }
 0x3a3   : > { %v1124_v61 = vrot.slane %v1065_v52, %v3947_v9 }
 0x3a5   : > { %v1125_v52 = vsel %vm853_vm0, %v1124_v61, %v1120_v17 }
 0x3a6   : > { %v1068_v29 = vpop.permute.xlu1 %1067  ;;  %v1164_v56 = vsel %vm922_vm3, %v1125_v52, %v1163_v47 }
 0x3a7   : > { %v1129_v28 = vrot.slane %v1068_v29, %v3943_v6 }
 0x3aa   : > { %v1071_v38 = vpop.permute.xlu1 %1070 }
 0x3ab   : > { %v1133_v63 = vrot.slane %v1071_v38, %v3947_v9  ;;  %v1147_v38 = vrot.slane %v1080_v26, %v3943_v6 }
 0x3ae   : > { %v1077_v1 = vpop.permute.xlu1 %1076 }
 0x3af   : > { %v1142_v31 = vrot.slane %v1077_v1, %v3947_v9  ;;  %v1134_v1 = vsel %vm853_vm0, %v1133_v63, %v1129_v28 }
 0x3b1   : > { %v1143_v29 = vsel %vm853_vm0, %v1142_v31, %v1138_v19 }
 0x3b2   : > { %v1083_v24 = vpop.permute.xlu1 %1082 }
 0x3b3   : > { %v1151_v7 = vrot.slane %v1083_v24, %v3947_v9  ;;  %v1165_v24 = vsel %vm924_vm4, %v1134_v1, %v1164_v56 }
 0x3b4   : > { %v1166_v40 = vsel %vm926_vm5, %v1143_v29, %v1165_v24  ;;  %v4550_v29 = vsub.s32 6, %v3940_v3 }
 0x3b5   : > { %v1152_v50 = vsel %vm853_vm0, %v1151_v7, %v1147_v38  ;;  %v4548_v38 = vsub.s32 1, %v3940_v3 }
 0x3b6   : > { %v1089_v34 = vpop.permute.xlu1 %1088  ;;  %v1167_v27 = vsel %vm928_vm6, %v1152_v50, %v1166_v40  ;;  %v1400_v50 = vld [vmem:[#allocation13] sm:$0xff]  ;;  %v1386_v40 = vld [vmem:[#allocation12 + $0x10] sm:$0xff] }
 0x3b7   : > { %v1160_v26 = vrot.slane %v1089_v34, %v3947_v9  ;;  %v1384_v34 = vld [vmem:[#allocation12] sm:$0xff] }
 0x3b9   : > { %v1161_v61 = vsel %vm853_vm0, %v1160_v26, %v1156_v11  ;;  %v3440_v11 = vmov 0.0|0.0  }
 0x3ba   : > { %v1168_v63 = vsel %vm930_vm7, %v1161_v61, %v1167_v27  ;;  %2499 = vmatprep.subr.bf16.mxu0 %v3440_v11  ;;  %2523 = vmatprep.subr.bf16.mxu1 %v3440_v11  ;;  %v1387_v61 = vld [vmem:[#allocation12 + $0x18] sm:$0xff]  ;;  %v1404_v27 = vld [vmem:[#allocation13 + $0x20] sm:$0xff] }
 0x3bb   : > { %v1170_v31 = vsel %vm933_vm8, %v1168_v63, 0.0  ;;  %v2527_v63 = vpack.c.bf16 %v1387_v61, %v1386_v40  ;;  %v1580_v61 = vld [vmem:[#allocation15] sm:$0xff] }
 0x3bc   : > { %1171 = vadd.xlane.f32.xlu0 %v1170_v31  ;;  %v1405_v31 = vld [vmem:[#allocation13 + $0x28] sm:$0xff] }
 0x449   : > { %v1172_v17 = vpop.xlane.xlu0 %1171 }
 0x44a   : > { %2848 = vrcp.f32 %v1172_v17  ;;  %v1388_v17 = vld [vmem:[#allocation12 + $0x20] sm:$0xff] }
 0x454   : > { %v2849_v33 = vpop.eup %2848 }
 0x455   : > { %v1194_v6 = vrot.slane %v2849_v33, %v956_v20  ;;  %v1178_v28 = vrot.slane %v2849_v33, %v3950_v12  ;;  %v1206_v19 = vrot.slane %v2849_v33, %v968_v4  ;;  %v1182_v42 = vrot.slane %v2849_v33, %v4548_v38  ;;  %v1408_v38 = vld [vmem:[#allocation13 + $0x40] sm:$0xff] }
 0x456   : > { %v1202_v56 = vrot.slane %v2849_v33, %v4550_v29  ;;  %v1396_v29 = vld [vmem:[#allocation12 + $0x60] sm:$0xff] }
 0x457   : > { %v1223_v9 = vmul.f32 %v4169_v41, %v1194_v6  ;;  %v1215_v5 = vmul.f32 %v4123_v15, %v1178_v28  ;;  %v1229_v52 = vmul.f32 %v4155_v10, %v1206_v19  ;;  %v1216_v7 = vmul.f32 %v4126_v18, %v1178_v28  ;;  %v1406_v28 = vld [vmem:[#allocation13 + $0x30] sm:$0xff] }
 0x458   : > { %v1217_v20 = vmul.f32 %v4132_v8, %v1182_v42  ;;  %v1218_v41 = vmul.f32 %v4138_v35, %v1182_v42  ;;  %v1186_v15 = vrot.slane %v2849_v33, %v4096_v36  ;;  %v1190_v18 = vrot.slane %v2849_v33, %v4114_v53  ;;  %v1409_v42 = vld [vmem:[#allocation13 + $0x48] sm:$0xff] }
 0x459   : > { %1273 = vperm.xlu0 %2814, %v1223_v9   ;;  %1233 = vperm.xlu1 %2813, %v1215_v5   ;;  %v1224_v8 = vmul.f32 %v4172_v0, %v1194_v6  ;;  %v4549_v35 = vsub.s32 5, %v3940_v3  ;;  %v1401_v0 = vld [vmem:[#allocation13 + $0x8] sm:$0xff]  ;;  %v1230_v3 = vmul.f32 %v4181_v58, %v1206_v19  ;;  %v2506_v6 = vpack.c.bf16 %v1405_v31, %v1404_v27  ;;  %v1407_v9 = vld [vmem:[#allocation13 + $0x38] sm:$0xff]  ;;  %v1390_v5 = vld [vmem:[#allocation12 + $0x30] sm:$0xff] }
 0x45a   : > { %v1219_v4 = vmul.f32 %v4145_v46, %v1186_v15  ;;  %v1220_v10 = vmul.f32 %v4152_v48, %v1186_v15  ;;  %v1221_v23 = vmul.f32 %v4160_v54, %v1190_v18  ;;  %v1222_v1 = vmul.f32 %v4165_v59, %v1190_v18  ;;  %v1410_v18 = vld [vmem:[#allocation13 + $0x50] sm:$0xff]  ;;  %v1584_v27 = vld [vmem:[#allocation15 + $0x20] sm:$0xff]  ;;  %v1589_v31 = vld [vmem:[#allocation15 + $0x48] sm:$0xff] }
 0x45b   : > { %v1198_v47 = vrot.slane %v2849_v33, %v4549_v35  ;;  %v1227_v54 = vmul.f32 %v4148_v14, %v1202_v56  ;;  %v1228_v59 = vmul.f32 %v4178_v2, %v1202_v56  ;;  %v2500_v24 = vpack.c.bf16 %v1401_v0, %v1400_v50  ;;  %v1402_v14 = vld [vmem:[#allocation13 + $0x10] sm:$0xff]  ;;  %v1403_v2 = vld [vmem:[#allocation13 + $0x18] sm:$0xff]  ;;  %v1389_v33 = vld [vmem:[#allocation12 + $0x28] sm:$0xff] }
 0x45c   : > { %v2503_v26 = vpack.c.bf16 %v1403_v2, %v1402_v14  ;;  %v2530_v58 = vpack.c.bf16 %v1389_v33, %v1388_v17  ;;  %v2509_v19 = vpack.c.bf16 %v1407_v9, %v1406_v28  ;;  %v3442_v15 = vmov 0.0   ;;  %v1397_v56 = vld [vmem:[#allocation12 + $0x68] sm:$0xff]  ;;  %v1414_v50 = vld [vmem:[#allocation13 + $0x70] sm:$0xff]  ;;  %v1415_v0 = vld [vmem:[#allocation13 + $0x78] sm:$0xff] }
 0x45d   : > { %1303 = vperm.xlu0 %2814, %v1229_v52   ;;  %1238 = vperm.xlu1 %2813, %v1216_v7   ;;  %v1225_v46 = vmul.f32 %v4141_v13, %v1198_v47  ;;  %v1226_v48 = vmul.f32 %v4175_v44, %v1198_v47  ;;  %v1385_v13 = vld [vmem:[#allocation12 + $0x8] sm:$0xff]  ;;  %v1391_v52 = vld [vmem:[#allocation12 + $0x38] sm:$0xff]  ;;  %v2521_v2 = vpack.c.bf16 %v1415_v0, %v1414_v50  ;;  %v1588_v28 = vld [vmem:[#allocation15 + $0x40] sm:$0xff] }
 0x45e   : > { %v2524_v44 = vpack.c.bf16 %v1385_v13, %v1384_v34  ;;  %2501 = vmatpush3.bf16.msra.mxu0 %v2500_v24  ;;  %v2533_v7 = vpack.c.bf16 %v1391_v52, %v1390_v5  ;;  %2461 = vmatprep.mubr.msk.f32.mxu0 %vm3441_vm9, %v3442_v15  ;;  %v1398_v34 = vld [vmem:[#allocation12 + $0x70] sm:$0xff]  ;;  %v1399_v24 = vld [vmem:[#allocation12 + $0x78] sm:$0xff]  ;;  %v1581_v13 = vld [vmem:[#allocation15 + $0x8] sm:$0xff] }
 0x45f   : > { %2502 = vmatprep.subr.bf16.mxu0 %v3440_v11  ;;  %2496 = vmatprep.mubr.msk.f32.mxu1 %vm3441_vm9, %v3442_v15  ;;  %v1587_v14 = vld [vmem:[#allocation15 + $0x38] sm:$0xff]  ;;  %v1593_v17 = vld [vmem:[#allocation15 + $0x68] sm:$0xff]  ;;  %v1592_v9 = vld [vmem:[#allocation15 + $0x60] sm:$0xff] }
 0x460   : > { %2525 = vmatpush3.bf16.msra.mxu1 %v2524_v44  ;;  %v1585_v44 = vld [vmem:[#allocation15 + $0x28] sm:$0xff]  ;;  %v2553_v52 = vpack.c.bf16 %v1592_v9, %v1588_v28  ;;  %v1624_v50 = vld [vmem:[#allocation15 + $0x160] sm:$0xff] }
 0x461   : > { %1243 = vperm.xlu1 %2813, %v1217_v20   ;;  %2526 = vmatprep.subr.bf16.mxu1 %v3440_v11  ;;  %v1392_v20 = vld [vmem:[#allocation12 + $0x40] sm:$0xff]  ;;  %v2547_v40 = vpack.c.bf16 %v1585_v44, %v1581_v13  ;;  %v1383_v33 = vld [vmem:[#allocation2] sm:$0xff] }
 0x462   : > { %2504 = vmatpush3.bf16.msra.mxu0 %v2503_v26  ;;  %v2545_v26 = vpack.c.bf16 %v1399_v24, %v1398_v34  ;;  %v1597_v5 = vld [vmem:[#allocation15 + $0x88] sm:$0xff]  ;;  %v1628_v44 = vld [vmem:[#allocation15 + $0x180] sm:$0xff] }
 0x463   : > { %2505 = vmatprep.subr.bf16.mxu0 %v3440_v11  ;;  %v1629_v0 = vld [vmem:[#allocation15 + $0x188] sm:$0xff] }
 0x464   : > { %2528 = vmatpush3.bf16.msra.mxu1 %v2527_v63  ;;  %v1633_v34 = vld [vmem:[#allocation15 + $0x1a8] sm:$0xff] }
 0x465   : > { %1248 = vperm.xlu1 %2813, %v1218_v41   ;;  %2529 = vmatprep.subr.bf16.mxu1 %v3440_v11  ;;  %v1393_v41 = vld [vmem:[#allocation12 + $0x48] sm:$0xff]  ;;  %v2571_v13 = vpack.c.bf16 %v1633_v34, %v1629_v0 }
 0x466   : > { %2507 = vmatpush3.bf16.msra.mxu0 %v2506_v6  ;;  %v2549_v6 = vpack.c.bf16 %v1584_v27, %v1580_v61 }
 0x467   : > { %2508 = vmatprep.subr.bf16.mxu0 %v3440_v11 }
 0x468   : > { %2531 = vmatpush3.bf16.msra.mxu1 %v2530_v58  ;;  %v2551_v58 = vpack.c.bf16 %v1593_v17, %v1589_v31 }
 0x469   : > { %1253 = vperm.xlu1 %2813, %v1219_v4   ;;  %2532 = vmatprep.subr.bf16.mxu1 %v3440_v11  ;;  %v2512_v4 = vpack.c.bf16 %v1409_v42, %v1408_v38  ;;  %v1600_v38 = vld [vmem:[#allocation15 + $0xa0] sm:$0xff]  ;;  %v1605_v42 = vld [vmem:[#allocation15 + $0xc8] sm:$0xff] }
 0x46a   : > { %2510 = vmatpush3.bf16.msra.mxu0 %v2509_v19  ;;  %v1601_v19 = vld [vmem:[#allocation15 + $0xa8] sm:$0xff] }
 0x46b   : > { %2511 = vmatprep.subr.bf16.mxu0 %v3440_v11 }
 0x46c   : > { %2534 = vmatpush3.bf16.msra.mxu1 %v2533_v7  ;;  %v1596_v7 = vld [vmem:[#allocation15 + $0x80] sm:$0xff] }
 0x46d   : > { %1258 = vperm.xlu1 %2813, %v1220_v10   ;;  %v2536_v10 = vpack.c.bf16 %v1393_v41, %v1392_v20  ;;  %2535 = vmatprep.subr.bf16.mxu1 %v3440_v11  ;;  %v1609_v20 = vld [vmem:[#allocation15 + $0xe8] sm:$0xff]  ;;  %v2557_v41 = vpack.c.bf16 %v1600_v38, %v1596_v7 }
 0x46e   : > { %2513 = vmatpush3.bf16.msra.mxu0 %v2512_v4  ;;  %v2559_v4 = vpack.c.bf16 %v1609_v20, %v1605_v42 }
 0x46f   : > { %2514 = vmatprep.subr.bf16.mxu0 %v3440_v11 }
 0x470   : > { %2537 = vmatpush3.bf16.msra.mxu1 %v2536_v10  ;;  %v1604_v10 = vld [vmem:[#allocation15 + $0xc0] sm:$0xff] }
 0x471   : > { %1263 = vperm.xlu1 %2813, %v1221_v23   ;;  %v1411_v23 = vld [vmem:[#allocation13 + $0x58] sm:$0xff]  ;;  %2538 = vmatprep.subr.bf16.mxu1 %v3440_v11 }
 0x472   : > { %v2515_v35 = vpack.c.bf16 %v1411_v23, %v1410_v18  ;;  %v1608_v18 = vld [vmem:[#allocation15 + $0xe0] sm:$0xff]  ;;  %v1613_v23 = vld [vmem:[#allocation15 + $0x108] sm:$0xff] }
 0x474   : > { %2516 = vmatpush3.bf16.msra.mxu0 %v2515_v35 }
 0x475   : > { %1268 = vperm.xlu1 %2813, %v1222_v1   ;;  %v1394_v1 = vld [vmem:[#allocation12 + $0x50] sm:$0xff]  ;;  %2517 = vmatprep.subr.bf16.mxu0 %v3440_v11 }
 0x479   : > { %1278 = vperm.xlu1 %2813, %v1224_v8   ;;  %v1395_v8 = vld [vmem:[#allocation12 + $0x58] sm:$0xff] }
 0x47a   : > { %v2539_v47 = vpack.c.bf16 %v1395_v8, %v1394_v1  ;;  %v1617_v1 = vld [vmem:[#allocation15 + $0x128] sm:$0xff]  ;;  %v2561_v8 = vpack.c.bf16 %v1608_v18, %v1604_v10 }
 0x47b   : > { %v2563_v35 = vpack.c.bf16 %v1617_v1, %v1613_v23 }
 0x47c   : > { %2540 = vmatpush3.bf16.msra.mxu1 %v2539_v47  ;;  %v1612_v47 = vld [vmem:[#allocation15 + $0x100] sm:$0xff] }
 0x47d   : > { %1283 = vperm.xlu1 %2813, %v1225_v46   ;;  %v1412_v46 = vld [vmem:[#allocation13 + $0x60] sm:$0xff]  ;;  %2541 = vmatprep.subr.bf16.mxu1 %v3440_v11 }
 0x481   : > { %1288 = vperm.xlu1 %2813, %v1226_v48   ;;  %v1413_v48 = vld [vmem:[#allocation13 + $0x68] sm:$0xff] }
 0x485   : > { %1293 = vperm.xlu1 %2813, %v1227_v54   ;;  %v2518_v54 = vpack.c.bf16 %v1413_v48, %v1412_v46  ;;  %v1616_v46 = vld [vmem:[#allocation15 + $0x120] sm:$0xff]  ;;  %v1621_v48 = vld [vmem:[#allocation15 + $0x148] sm:$0xff] }
 0x487   : > { %2519 = vmatpush3.bf16.msra.mxu0 %v2518_v54 }
 0x488   : > { %2520 = vmatprep.subr.bf16.mxu0 %v3440_v11 }
 0x489   : > { %1298 = vperm.xlu1 %2813, %v1228_v59   ;;  %v2542_v59 = vpack.c.bf16 %v1397_v56, %v1396_v29  ;;  %v1625_v29 = vld [vmem:[#allocation15 + $0x168] sm:$0xff]  ;;  %v2565_v56 = vpack.c.bf16 %v1616_v46, %v1612_v47 }
 0x48a   : > { %v2567_v54 = vpack.c.bf16 %v1625_v29, %v1621_v48 }
 0x48b   : > { %2543 = vmatpush3.bf16.msra.mxu1 %v2542_v59  ;;  %2522 = vmatpush3.bf16.msra.mxu0 %v2521_v2  ;;  %v1620_v59 = vld [vmem:[#allocation15 + $0x140] sm:$0xff] }
 0x48c   : > { %2544 = vmatprep.subr.bf16.mxu1 %v3440_v11  ;;  %2548 = vmatprep.subr.bf16.mxu0 %v2547_v40  ;;  %v2555_v11 = vpack.c.bf16 %v1601_v19, %v1597_v5  ;;  %v2569_v24 = vpack.c.bf16 %v1624_v50, %v1620_v59 }
 0x48d   : > { %1308 = vperm.xlu1 %2813, %v1230_v3   ;;  %v1583_v3 = vld [vmem:[#allocation15 + $0x18] sm:$0xff] }
 0x48e   : > { %v2579_v63 = vpack.c.bf16 %v1587_v14, %v1583_v3  ;;  %2462 = vmatmul.mubr.f32.vlgmr.msra.gmra.mrb[0].mxu0 %v1383_v33  ;;  %v1632_v3 = vld [vmem:[#allocation15 + $0x1a0] sm:$0xff] }
 0x48f   : > { %2546 = vmatpush3.bf16.msra.mxu1 %v2545_v26  ;;  %2550 = vmatpush1.bf16.msra.mxu0 %v2549_v6  ;;  %v2573_v14 = vpack.c.bf16 %v1632_v3, %v1628_v44 }
 0x490   : > { %2580 = vmatprep.subr.bf16.mxu1 %v2579_v63  ;;  %1725 = vmatprep.mubr.f32.mxu0 %v3442_v15 }
 0x491   : > { %2552 = vmatprep.subr.bf16.mxu0 %v2551_v58 }
 0x493   : > { %2554 = vmatpush1.bf16.msra.mxu0 %v2553_v52 }
 0x494   : > { %2556 = vmatprep.subr.bf16.mxu0 %v2555_v11 }
 0x497   : > { %2558 = vmatpush1.bf16.msra.mxu0 %v2557_v41 }
 0x498   : > { %2560 = vmatprep.subr.bf16.mxu0 %v2559_v4 }
 0x49b   : > { %2562 = vmatpush1.bf16.msra.mxu0 %v2561_v8 }
 0x49c   : > { %2564 = vmatprep.subr.bf16.mxu0 %v2563_v35 }
 0x49f   : > { %2566 = vmatpush1.bf16.msra.mxu0 %v2565_v56 }
 0x4a0   : > { %2568 = vmatprep.subr.bf16.mxu0 %v2567_v54 }
 0x4a3   : > { %2570 = vmatpush1.bf16.msra.mxu0 %v2569_v24 }
 0x4a4   : > { %2572 = vmatprep.subr.bf16.mxu0 %v2571_v13 }
 0x4a7   : > { %2574 = vmatpush1.bf16.msra.mxu0 %v2573_v14 }
 0x4d8   : > { %v1234_v2 = vpop.permute.xlu1 %1233  ;;  %v1274_v28 = vpop.permute.xlu0 %1273 }
 0x4d9   : > { %v1311_v7 = vmul.f32 %v1234_v2, %v3952_v16 }
 0x4dc   : > { %v1239_v26 = vpop.permute.xlu1 %1238  ;;  %v1304_v50 = vpop.permute.xlu0 %1303 }
 0x4dd   : > { %v1312_v9 = vmul.f32 %v1239_v26, %v3957_v22  ;;  %v1325_v14 = vmul.f32 %v1304_v50, %v4001_v60 }
 0x4df   : > { %v1327_v41 = vadd.f32 %v1312_v9, %v1311_v7 }
 0x4e0   : > { %v1244_v40 = vpop.permute.xlu1 %1243 }
 0x4e1   : > { %v1313_v5 = vmul.f32 %v1244_v40, %v3955_v21 }
 0x4e4   : > { %v1249_v61 = vpop.permute.xlu1 %1248 }
 0x4e5   : > { %v1314_v33 = vmul.f32 %v1249_v61, %v3961_v25  ;;  %v1319_v25 = vmul.f32 %v1274_v28, %v3973_v37 }
 0x4e7   : > { %v1334_v38 = vadd.f32 %v1314_v33, %v1313_v5 }
 0x4e8   : > { %v1254_v27 = vpop.permute.xlu1 %1253 }
 0x4e9   : > { %v1315_v52 = vmul.f32 %v1254_v27, %v3966_v30  ;;  %v1335_v10 = vrot.slane %v1334_v38, 4 }
 0x4eb   : > { %v1336_v1 = vadd.f32 %v1335_v10, %v1334_v38 }
 0x4ec   : > { %v1259_v63 = vpop.permute.xlu1 %1258 }
 0x4ed   : > { %v1316_v6 = vmul.f32 %v1259_v63, %v3969_v32  ;;  %v1337_v29 = vrot.slane %v1336_v1, 2 }
 0x4ef   : > { %v1341_v32 = vadd.f32 %v1316_v6, %v1315_v52  ;;  %v1338_v13 = vadd.f32 %v1337_v29, %v1336_v1 }
 0x4f0   : > { %v1264_v31 = vpop.permute.xlu1 %1263 }
 0x4f1   : > { %v1317_v42 = vmul.f32 %v1264_v31, %v3980_v43  ;;  %v1342_v21 = vrot.slane %v1341_v32, 4 }
 0x4f3   : > { %v1343_v43 = vadd.f32 %v1342_v21, %v1341_v32 }
 0x4f4   : > { %v1269_v17 = vpop.permute.xlu1 %1268 }
 0x4f5   : > { %v1318_v19 = vmul.f32 %v1269_v17, %v3983_v45  ;;  %v1328_v45 = vrot.slane %v1327_v41, 4  ;;  %v1344_v54 = vrot.slane %v1343_v43, 2  ;;  %v1339_v17 = vrot.slane %v1338_v13, 1 }
 0x4f7   : > { %v1348_v4 = vadd.f32 %v1318_v19, %v1317_v42  ;;  %v1329_v37 = vadd.f32 %v1328_v45, %v1327_v41  ;;  %v1345_v2 = vadd.f32 %v1344_v54, %v1343_v43  ;;  %v1340_v52 = vadd.f32 %v1339_v17, %v1338_v13  ;;  %v1586_v45 = vld [vmem:[#allocation15 + $0x30] sm:$0xff]  ;;  %v1603_v54 = vld [vmem:[#allocation15 + $0xb8] sm:$0xff] }
 0x4f8   : > { %v1279_v58 = vpop.permute.xlu1 %1278 }
 0x4f9   : > { %v1320_v11 = vmul.f32 %v1279_v58, %v3976_v39  ;;  %v1349_v23 = vrot.slane %v1348_v4, 4  ;;  %v1330_v0 = vrot.slane %v1329_v37, 2  ;;  %v1346_v58 = vrot.slane %v1345_v2, 1 }
 0x4fb   : > { %v1355_v22 = vadd.f32 %v1320_v11, %v1319_v25  ;;  %v1350_v47 = vadd.f32 %v1349_v23, %v1348_v4  ;;  %v1331_v40 = vadd.f32 %v1330_v0, %v1329_v37  ;;  %v1347_v38 = vadd.f32 %v1346_v58, %v1345_v2  ;;  %v1598_v0 = vld [vmem:[#allocation15 + $0x90] sm:$0xff]  ;;  %v1619_v2 = vld [vmem:[#allocation15 + $0x138] sm:$0xff] }
 0x4fc   : > { %v1284_v20 = vpop.permute.xlu1 %1283  ;;  %v1635_v58 = vld [vmem:[#allocation15 + $0x1b8] sm:$0xff] }
 0x4fd   : > { %v1321_v30 = vmul.f32 %v1284_v20, %v3987_v49  ;;  %v1356_v16 = vrot.slane %v1355_v22, 4  ;;  %v1351_v34 = vrot.slane %v1350_v47, 2 }
 0x4ff   : > { %v1357_v48 = vadd.f32 %v1356_v16, %v1355_v22  ;;  %v1352_v61 = vadd.f32 %v1351_v34, %v1350_v47  ;;  %v1595_v16 = vld [vmem:[#allocation15 + $0x78] sm:$0xff]  ;;  %v1602_v34 = vld [vmem:[#allocation15 + $0xb0] sm:$0xff] }
 0x500   : > { %v1289_v18 = vpop.permute.xlu1 %1288 }
 0x501   : > { %v1322_v39 = vmul.f32 %v1289_v18, %v3990_v51  ;;  %v1358_v24 = vrot.slane %v1357_v48, 2  ;;  %v1353_v28 = vrot.slane %v1352_v61, 1  ;;  %v1582_v18 = vld [vmem:[#allocation15 + $0x10] sm:$0xff] }
 0x503   : > { %v1362_v8 = vadd.f32 %v1322_v39, %v1321_v30  ;;  %v1359_v31 = vadd.f32 %v1358_v24, %v1357_v48  ;;  %v1354_v25 = vadd.f32 %v1353_v28, %v1352_v61  ;;  %v1591_v39 = vld [vmem:[#allocation15 + $0x58] sm:$0xff]  ;;  %v1594_v48 = vld [vmem:[#allocation15 + $0x70] sm:$0xff]  ;;  %v2589_v24 = vpack.c.bf16 %v1602_v34, %v1598_v0 }
 0x504   : > { %v1294_v35 = vpop.permute.xlu1 %1293  ;;  %v2583_v47 = vpack.c.bf16 %v1595_v16, %v1591_v39  ;;  %v1614_v61 = vld [vmem:[#allocation15 + $0x110] sm:$0xff] }
 0x505   : > { %v1363_v46 = vrot.slane %v1362_v8, 4  ;;  %v1323_v49 = vmul.f32 %v1294_v35, %v3994_v55  ;;  %v1360_v19 = vrot.slane %v1359_v31, 1  ;;  %v2581_v35 = vpack.c.bf16 %v1586_v45, %v1582_v18  ;;  %v2371_v18 = vld [vmem:[%s4486_s6] ss:$0 sm:$0xff] }
 0x506   : > { %v1644_v39 = vld [vmem:[%s4551_s12] sm:$0xf] }
 0x507   : > { %v1364_v56 = vadd.f32 %v1363_v46, %v1362_v8  ;;  %v1361_v20 = vadd.f32 %v1360_v19, %v1359_v31  ;;  %v1590_v46 = vld [vmem:[#allocation15 + $0x50] sm:$0xff]  ;;  %v1649_v16 = vrot.slane %v1644_v39, %v3950_v12 }
 0x508   : > { %v1299_v59 = vpop.permute.xlu1 %1298 }
 0x509   : > { %v1324_v51 = vmul.f32 %v1299_v59, %v3997_v57  ;;  %v1365_v44 = vrot.slane %v1364_v56, 2  ;;  %v1332_v57 = vrot.slane %v1331_v40, 1  ;;  %v2585_v59 = vpack.c.bf16 %v1594_v48, %v1590_v46 }
 0x50b   : > { %v1369_v3 = vadd.f32 %v1324_v51, %v1323_v49  ;;  %v1366_v33 = vadd.f32 %v1365_v44, %v1364_v56  ;;  %v1333_v42 = vadd.f32 %v1332_v57, %v1331_v40  ;;  %v1599_v56 = vld [vmem:[#allocation15 + $0x98] sm:$0xff]  ;;  %v1606_v44 = vld [vmem:[#allocation15 + $0xd0] sm:$0xff] }
 0x50c   : > { %v1309_v26 = vpop.permute.xlu1 %1308  ;;  %v2587_v50 = vpack.c.bf16 %v1603_v54, %v1599_v56  ;;  %v1607_v49 = vld [vmem:[#allocation15 + $0xd8] sm:$0xff] }
 0x50d   : > { %v1370_v27 = vrot.slane %v1369_v3, 4  ;;  %v1326_v63 = vmul.f32 %v1309_v26, %v4004_v62  ;;  %v1367_v60 = vrot.slane %v1366_v33, 1  ;;  %v1494_v41 = vsel %vm918_vm1, %v1340_v52, %v1333_v42  ;;  %v1611_v51 = vld [vmem:[#allocation15 + $0xf8] sm:$0xff]  ;;  %v1637_v52 = vld [vmem:[#allocation15 + $0x1c8] sm:$0xff]  ;;  %v1636_v42 = vld [vmem:[#allocation15 + $0x1c0] sm:$0xff] }
 0x50e   : > { %v1495_v21 = vsel %vm920_vm2, %v1347_v38, %v1494_v41  ;;  %v2591_v13 = vpack.c.bf16 %v1611_v51, %v1607_v49  ;;  %v1643_v38 = vld [vmem:[#allocation15 + $0x1f8] sm:$0xff]  ;;  %v1642_v41 = vld [vmem:[#allocation15 + $0x1f0] sm:$0xff] }
 0x50f   : > { %v1371_v6 = vadd.f32 %v1370_v27, %v1369_v3  ;;  %v1376_v55 = vadd.f32 %v1326_v63, %v1325_v14  ;;  %v1368_v4 = vadd.f32 %v1367_v60, %v1366_v33  ;;  %v1496_v30 = vsel %vm922_vm3, %v1354_v25, %v1495_v21  ;;  %v1610_v3 = vld [vmem:[#allocation15 + $0xf0] sm:$0xff]  ;;  %v1615_v14 = vld [vmem:[#allocation15 + $0x118] sm:$0xff]  ;;  %v1641_v60 = vld [vmem:[#allocation15 + $0x1e8] sm:$0xff] }
 0x510   : > { %v1497_v1 = vsel %vm924_vm4, %v1361_v20, %v1496_v30  ;;  %v2593_v26 = vpack.c.bf16 %v1610_v3, %v1606_v44  ;;  %v2595_v40 = vpack.c.bf16 %v1619_v2, %v1615_v14  ;;  %v1623_v27 = vld [vmem:[#allocation15 + $0x158] sm:$0xff]  ;;  %v1622_v33 = vld [vmem:[#allocation15 + $0x150] sm:$0xff]  ;;  %v1640_v25 = vld [vmem:[#allocation15 + $0x1e0] sm:$0xff] }
 0x511   : > { %v1372_v9 = vrot.slane %v1371_v6, 2  ;;  %v1377_v5 = vrot.slane %v1376_v55, 4  ;;  %v1498_v43 = vsel %vm926_vm5, %v1368_v4, %v1497_v1  ;;  %v1627_v63 = vld [vmem:[#allocation15 + $0x178] sm:$0xff]  ;;  %v1638_v20 = vld [vmem:[#allocation15 + $0x1d0] sm:$0xff] }
 0x512   : > { %v2599_v17 = vpack.c.bf16 %v1627_v63, %v1623_v27  ;;  %v2609_v4 = vpack.c.bf16 %v1642_v41, %v1638_v20 }
 0x513   : > { %v1373_v11 = vadd.f32 %v1372_v9, %v1371_v6  ;;  %v1378_v7 = vadd.f32 %v1377_v5, %v1376_v55  ;;  %v1626_v6 = vld [vmem:[#allocation15 + $0x170] sm:$0xff]  ;;  %v1631_v55 = vld [vmem:[#allocation15 + $0x198] sm:$0xff] }
 0x514   : > { %v2601_v57 = vpack.c.bf16 %v1626_v6, %v1622_v33  ;;  %v2603_v28 = vpack.c.bf16 %v1635_v58, %v1631_v55  ;;  %v1630_v9 = vld [vmem:[#allocation15 + $0x190] sm:$0xff] }
 0x515   : > { %v1374_v32 = vrot.slane %v1373_v11, 1  ;;  %v1379_v62 = vrot.slane %v1378_v7, 2  ;;  %v1634_v5 = vld [vmem:[#allocation15 + $0x1b0] sm:$0xff] }
 0x516   : > { %v2605_v19 = vpack.c.bf16 %v1634_v5, %v1630_v9 }
 0x517   : > { %v1380_v22 = vadd.f32 %v1379_v62, %v1378_v7  ;;  %v1375_v10 = vadd.f32 %v1374_v32, %v1373_v11  ;;  %v1639_v11 = vld [vmem:[#allocation15 + $0x1d8] sm:$0xff]  ;;  %v2575_v7 = vpack.c.bf16 %v1641_v60, %v1637_v52  ;;  %v2577_v62 = vpack.c.bf16 %v1640_v25, %v1636_v42 }
 0x518   : > { %v2607_v32 = vpack.c.bf16 %v1643_v38, %v1639_v11 }
 0x519   : > { %v1381_v23 = vrot.slane %v1380_v22, 1  ;;  %v1499_v37 = vsel %vm928_vm6, %v1375_v10, %v1498_v43  ;;  %2576 = vmatprep.subr.bf16.mxu0 %v2575_v7 }
 0x51a   : > { %2578 = vmatpush1.bf16.msra.mxu0 %v2577_v62 }
 0x51b   : > { %v1382_v8 = vadd.f32 %v1381_v23, %v1380_v22 }
 0x51d   : > { %v1500_v29 = vsel %vm930_vm7, %v1382_v8, %v1499_v37  ;;  %v1657_v37 = vrot.slane %v1644_v39, %v4114_v53 }
 0x51e   : > { %2497 = vmatmul.mubr.f32.vlgmr.msra.gmra.mrb[0].mxu1 %v1500_v29  ;;  %1821 = vst [vmem:[#allocation22] sm:$0xff] %v1500_v29  ;;  %v1653_v29 = vrot.slane %v1644_v39, %v4096_v36 }
 0x51f   : > { %2582 = vmatpush1.bf16.msra.mxu1 %v2581_v35  ;;  %1795 = vmatprep.mubr.f32.mxu1 %v3442_v15  ;;  %v1618_v15 = vld [vmem:[#allocation15 + $0x130] sm:$0xff] }
 0x520   : > { %2584 = vmatprep.subr.bf16.mxu1 %v2583_v47  ;;  %v2597_v31 = vpack.c.bf16 %v1618_v15, %v1614_v61 }
 0x523   : > { %2586 = vmatpush1.bf16.msra.mxu1 %v2585_v59 }
 0x524   : > { %2588 = vmatprep.subr.bf16.mxu1 %v2587_v50 }
 0x527   : > { %2590 = vmatpush1.bf16.msra.mxu1 %v2589_v24 }
 0x528   : > { %2592 = vmatprep.subr.bf16.mxu1 %v2591_v13 }
 0x52b   : > { %2594 = vmatpush1.bf16.msra.mxu1 %v2593_v26 }
 0x52c   : > { %2596 = vmatprep.subr.bf16.mxu1 %v2595_v40 }
 0x52f   : > { %2598 = vmatpush1.bf16.msra.mxu1 %v2597_v31 }
 0x530   : > { %2600 = vmatprep.subr.bf16.mxu1 %v2599_v17 }
 0x533   : > { %2602 = vmatpush1.bf16.msra.mxu1 %v2601_v57 }
 0x534   : > { %2604 = vmatprep.subr.bf16.mxu1 %v2603_v28 }
 0x537   : > { %2606 = vmatpush1.bf16.msra.mxu1 %v2605_v19 }
 0x538   : > { %2608 = vmatprep.subr.bf16.mxu1 %v2607_v32 }
 0x53b   : > { %2610 = vmatpush1.bf16.msra.mxu1 %v2609_v4 }
 0x561   : > { %v1482_v22 = vpop.f32.mrb[0].mxu0 }
 0x562   : > { %v2463_v10 = vpop.f32.mrb[1].mxu0 }
 0x5f1   : > { %v1568_v21 = vpop.f32.mrb[0].mxu1 }
 0x5f2   : > { %v1569_v45 = vadd.f32 %v1568_v21, %v1482_v22  ;;  %v2498_v23 = vpop.f32.mrb[1].mxu1 }
 0x5f4   : > { %v1579_v30 = vadd.f32 %v2371_v18, %v1569_v45 }
 0x5f6   : > { %1726 = vmatmul.mubr.f32.vlgmr.msra.gmra.mrb[2].mxu0 %v1579_v30  ;;  %1796 = vmatmul.mubr.f32.vlgmr.msra.gmra.mrb[2].mxu1 %v1579_v30 }
 0x6c9   : > { %v1727_v1 = vpop.f32.mrb[2].mxu0  ;;  %v1797_v8 = vpop.f32.mrb[2].mxu1 }
 0x6ca   : > { %v1728_v43 = vadd.f32 %v1727_v1, %v1649_v16  ;;  %v1729_v35 = vpop.f32.mrb[3].mxu0  ;;  %v1799_v47 = vpop.f32.mrb[3].mxu1  ;;  %v1798_v54 = vadd.f32 %v1797_v8, %v1653_v29 }
 0x6cb   : > { %v1800_v48 = vadd.f32 %v1799_v47, %v1657_v37 }
 0x6cc   : > { %v2372_v46 = vmul.f32 -1.442695, %v1728_v43 }
 0x6cd   : > { %v2373_v56 = vmul.f32 -1.442695, %v1800_v48 }
 0x6ce   : > { %2850 = vpow2.f32 %v2372_v46 }
 0x6cf   : > { %2852 = vpow2.f32 %v2373_v56 }
 0x6d0   : > { %2854 = vtanh.f32 %v1798_v54 }
 0x6d8   : > { %v2851_v59 = vpop.eup %2850 }
 0x6d9   : > { %v1805_v50 = vadd.f32 1.0, %v2851_v59  ;;  %v2853_v12 = vpop.eup %2852 }
 0x6da   : > { %v1812_v0 = vadd.f32 1.0, %v2853_v12  ;;  %v2855_v34 = vpop.eup %2854 }
 0x6db   : > { %2856 = vrcp.f32 %v1805_v50 }
 0x6dc   : > { %2858 = vrcp.f32 %v1812_v0 }
 0x6e5   : > { %v2857_v49 = vpop.eup %2856 }
 0x6e6   : > { %v1815_v51 = vmul.f32 %v2857_v49, %v2855_v34  ;;  %v2859_v53 = vpop.eup %2858 }
 0x6e8   : > { %2860 = vtanh.f32 %v1815_v51  ;;  %1820 = vst [vmem:[#allocation21] sm:$0xff] %v1815_v51 }
 0x6f2   : > { %v2861_v24 = vpop.eup %2860 }
 0x6f3   : > { %v1817_v13 = vmul.f32 %v2861_v24, %v2859_v53 }
 0x6f5   : > { %1818 = vst [vmem:[#allocation3] sm:$0xff] %v1817_v13  ;;  %1819 = vst [vmem:[#allocation19] sm:$0xff] %v1817_v13 }
 0x6f6 PF: > { %v1824_v36 = vld [vmem:[%s3794_s19 + $0x8] sm:$0xff]  ;;  %v1826_v3 = vld [vmem:[%s3794_s19 + $0x18] sm:$0xff]  ;;  %v1823_v26 = vld [vmem:[%s3794_s19] sm:$0xff]  ;;  %v3443_v61 = vmov 0.0   ;;  %s3444_s13 = smov [#allocation19]   ;;  %p4552_p12 = scmp.eq.s32.totalorder %s3556_s0, 3 }
 0x6f7   : > { %v1828_v44 = vld [vmem:[%s3794_s19 + $0x28] sm:$0xff]  ;;  %v1830_v2 = vld [vmem:[%s3794_s19 + $0x38] sm:$0xff]  ;;  %v1827_v40 = vld [vmem:[%s3794_s19 + $0x20] sm:$0xff]  ;;  %1973 = vmatprep.mubr.f32.mxu0 %v3443_v61  ;;  %2044 = vmatprep.mubr.f32.mxu1 %v3443_v61  ;;  %s2081_s5 = sshll.u32 %s3444_s13, 4  ;;  %s2082_s5 = int_to_ptr.vmem [resolvable:$true] %s2081_s5 }
 0x6f8   : > { %v2611_v14 = vpack.c.bf16 %v1828_v44, %v1824_v36  ;;  %v2643_v15 = vpack.c.bf16 %v1830_v2, %v1826_v3  ;;  %v2613_v27 = vpack.c.bf16 %v1827_v40, %v1823_v26  ;;  %v1825_v63 = vld [vmem:[%s3794_s19 + $0x10] sm:$0xff]  ;;  %v1832_v17 = vld [vmem:[%s3794_s19 + $0x48] sm:$0xff]  ;;  %v1834_v55 = vld [vmem:[%s3794_s19 + $0x58] sm:$0xff]  ;;  %s3234_s23 = scalar_lea.vmem %s2082_s5, 128  ;;  %p3241_p0 = scmp.lt.s32.totalorder %s2082_s5, %s2082_s5 }
 0x6f9   : > { %v1829_v31 = vld [vmem:[%s3794_s19 + $0x30] sm:$0xff]  ;;  %v1836_v6 = vld [vmem:[%s3794_s19 + $0x68] sm:$0xff]  ;;  %v1838_v58 = vld [vmem:[%s3794_s19 + $0x78] sm:$0xff]  ;;  %p3235_p7 = scmp.ne.s32.totalorder %s2082_s5, %s3234_s23  ;;  %p3242_p6 = scmp.lt.s32.totalorder %s3234_s23, %s3234_s23 }
 0x6fa   : > { %2612 = vmatprep.subr.bf16.mxu0 %v2611_v14  ;;  %v2645_v33 = vpack.c.bf16 %v1829_v31, %v1825_v63  ;;  %2644 = vmatprep.subr.bf16.mxu1 %v2643_v15  ;;  %v2615_v57 = vpack.c.bf16 %v1836_v6, %v1832_v17  ;;  %v2647_v28 = vpack.c.bf16 %v1838_v58, %v1834_v55  ;;  %v1831_v9 = vld [vmem:[%s3794_s19 + $0x40] sm:$0xff]  ;;  %v1833_v19 = vld [vmem:[%s3794_s19 + $0x50] sm:$0xff]  ;;  %v1840_v11 = vld [vmem:[%s3794_s19 + $0x88] sm:$0xff] }
 0x6fb   : > { %2614 = vmatpush1.bf16.msra.mxu0 %v2613_v27  ;;  %v1835_v5 = vld [vmem:[%s3794_s19 + $0x60] sm:$0xff]  ;;  %v1837_v60 = vld [vmem:[%s3794_s19 + $0x70] sm:$0xff]  ;;  %v1844_v7 = vld [vmem:[%s3794_s19 + $0xa8] sm:$0xff]  ;;  %p3236_p9 = pnand %p3235_p7, %p4552_p12  ;;  %p3243_p10 = por %p3242_p6, %p3241_p0 }
 0x6fc   : > { %2646 = vmatpush1.bf16.msra.mxu1 %v2645_v33  ;;  %v2617_v52 = vpack.c.bf16 %v1835_v5, %v1831_v9  ;;  %2616 = vmatprep.subr.bf16.mxu0 %v2615_v57  ;;  %v2649_v38 = vpack.c.bf16 %v1837_v60, %v1833_v19  ;;  %v2619_v42 = vpack.c.bf16 %v1844_v7, %v1840_v11  ;;  %v1842_v25 = vld [vmem:[%s3794_s19 + $0x98] sm:$0xff]  ;;  %v1839_v62 = vld [vmem:[%s3794_s19 + $0x80] sm:$0xff]  ;;  %v1841_v4 = vld [vmem:[%s3794_s19 + $0x90] sm:$0xff] }
 0x6fd   : > { %2648 = vmatprep.subr.bf16.mxu1 %v2647_v28  ;;  %v1846_v32 = vld [vmem:[%s3794_s19 + $0xb8] sm:$0xff]  ;;  %v1843_v41 = vld [vmem:[%s3794_s19 + $0xa0] sm:$0xff]  ;;  %v1845_v22 = vld [vmem:[%s3794_s19 + $0xb0] sm:$0xff]  ;;  %p3237_p11 = pneg %p3236_p9 }
 0x6fe   : > { %v2651_v20 = vpack.c.bf16 %v1846_v32, %v1842_v25  ;;  %v2621_v10 = vpack.c.bf16 %v1843_v41, %v1839_v62  ;;  %v1848_v21 = vld [vmem:[%s3794_s19 + $0xc8] sm:$0xff]  ;;  %v1850_v45 = vld [vmem:[%s3794_s19 + $0xd8] sm:$0xff]  ;;  %v2653_v23 = vpack.c.bf16 %v1845_v22, %v1841_v4  ;;  %v1847_v16 = vld [vmem:[%s3794_s19 + $0xc0] sm:$0xff] }
 0x6ff   : > { %2618 = vmatpush1.bf16.msra.mxu0 %v2617_v52  ;;  %v1852_v18 = vld [vmem:[%s3794_s19 + $0xe8] sm:$0xff]  ;;  %v1854_v39 = vld [vmem:[%s3794_s19 + $0xf8] sm:$0xff]  ;;  %v1851_v1 = vld [vmem:[%s3794_s19 + $0xe0] sm:$0xff]  ;;  %p3244_p1 = pnand %p3243_p10, %p3237_p11 }
 0x700   : > { %2650 = vmatpush1.bf16.msra.mxu1 %v2649_v38  ;;  %2620 = vmatprep.subr.bf16.mxu0 %v2619_v42  ;;  %v2623_v30 = vpack.c.bf16 %v1852_v18, %v1848_v21  ;;  %v2655_v8 = vpack.c.bf16 %v1854_v39, %v1850_v45  ;;  %v1849_v43 = vld [vmem:[%s3794_s19 + $0xd0] sm:$0xff]  ;;  %v1856_v37 = vld [vmem:[%s3794_s19 + $0x108] sm:$0xff]  ;;  %v1858_v46 = vld [vmem:[%s3794_s19 + $0x118] sm:$0xff]  ;;  %v2625_v29 = vpack.c.bf16 %v1851_v1, %v1847_v16 }
 0x701   : > { %2652 = vmatprep.subr.bf16.mxu1 %v2651_v20  ;;  %v1853_v35 = vld [vmem:[%s3794_s19 + $0xf0] sm:$0xff]  ;;  %v1860_v47 = vld [vmem:[%s3794_s19 + $0x128] sm:$0xff]  ;;  %v1862_v48 = vld [vmem:[%s3794_s19 + $0x138] sm:$0xff] }
 0x702   : > { %v2657_v56 = vpack.c.bf16 %v1853_v35, %v1849_v43  ;;  %v2627_v54 = vpack.c.bf16 %v1860_v47, %v1856_v37  ;;  %v1855_v59 = vld [vmem:[%s3794_s19 + $0x100] sm:$0xff]  ;;  %v1857_v12 = vld [vmem:[%s3794_s19 + $0x110] sm:$0xff]  ;;  %v2659_v0 = vpack.c.bf16 %v1862_v48, %v1858_v46  ;;  %v1864_v49 = vld [vmem:[%s3794_s19 + $0x148] sm:$0xff] }
 0x703   : > { %2622 = vmatpush1.bf16.msra.mxu0 %v2621_v10  ;;  %v1859_v50 = vld [vmem:[%s3794_s19 + $0x120] sm:$0xff]  ;;  %v1861_v34 = vld [vmem:[%s3794_s19 + $0x130] sm:$0xff]  ;;  %v1868_v51 = vld [vmem:[%s3794_s19 + $0x168] sm:$0xff] }
 0x704   : > { %2654 = vmatpush1.bf16.msra.mxu1 %v2653_v23  ;;  %2624 = vmatprep.subr.bf16.mxu0 %v2623_v30  ;;  %v1866_v53 = vld [vmem:[%s3794_s19 + $0x158] sm:$0xff]  ;;  %v2629_v13 = vpack.c.bf16 %v1859_v50, %v1855_v59  ;;  %v2661_v36 = vpack.c.bf16 %v1861_v34, %v1857_v12  ;;  %v2631_v44 = vpack.c.bf16 %v1868_v51, %v1864_v49  ;;  %v1863_v3 = vld [vmem:[%s3794_s19 + $0x140] sm:$0xff]  ;;  %v1865_v2 = vld [vmem:[%s3794_s19 + $0x150] sm:$0xff] }
 0x705   : > { %2656 = vmatprep.subr.bf16.mxu1 %v2655_v8  ;;  %v1870_v24 = vld [vmem:[%s3794_s19 + $0x178] sm:$0xff]  ;;  %v1867_v14 = vld [vmem:[%s3794_s19 + $0x160] sm:$0xff]  ;;  %v1869_v40 = vld [vmem:[%s3794_s19 + $0x170] sm:$0xff] }
 0x706   : > { %v2663_v26 = vpack.c.bf16 %v1870_v24, %v1866_v53  ;;  %v1872_v61 = vld [vmem:[%s3794_s19 + $0x188] sm:$0xff]  ;;  %v1874_v27 = vld [vmem:[%s3794_s19 + $0x198] sm:$0xff]  ;;  %v2633_v31 = vpack.c.bf16 %v1867_v14, %v1863_v3  ;;  %v2665_v17 = vpack.c.bf16 %v1869_v40, %v1865_v2  ;;  %v1871_v6 = vld [vmem:[%s3794_s19 + $0x180] sm:$0xff] }
 0x707   : > { %2626 = vmatpush1.bf16.msra.mxu0 %v2625_v29  ;;  %v1876_v15 = vld [vmem:[%s3794_s19 + $0x1a8] sm:$0xff]  ;;  %v1878_v63 = vld [vmem:[%s3794_s19 + $0x1b8] sm:$0xff]  ;;  %v1875_v55 = vld [vmem:[%s3794_s19 + $0x1a0] sm:$0xff] }
 0x708   : > { %2658 = vmatpush1.bf16.msra.mxu1 %v2657_v56  ;;  %2628 = vmatprep.subr.bf16.mxu0 %v2627_v54  ;;  %v2635_v33 = vpack.c.bf16 %v1876_v15, %v1872_v61  ;;  %v1873_v58 = vld [vmem:[%s3794_s19 + $0x190] sm:$0xff]  ;;  %v2667_v57 = vpack.c.bf16 %v1878_v63, %v1874_v27  ;;  %v1880_v9 = vld [vmem:[%s3794_s19 + $0x1c8] sm:$0xff]  ;;  %v1882_v19 = vld [vmem:[%s3794_s19 + $0x1d8] sm:$0xff]  ;;  %v2637_v60 = vpack.c.bf16 %v1875_v55, %v1871_v6 }
 0x709   : > { %2660 = vmatprep.subr.bf16.mxu1 %v2659_v0  ;;  %v1877_v28 = vld [vmem:[%s3794_s19 + $0x1b0] sm:$0xff]  ;;  %v1884_v5 = vld [vmem:[%s3794_s19 + $0x1e8] sm:$0xff]  ;;  %v1886_v52 = vld [vmem:[%s3794_s19 + $0x1f8] sm:$0xff] }
 0x70a   : > { %v2669_v11 = vpack.c.bf16 %v1877_v28, %v1873_v58  ;;  %v2639_v7 = vpack.c.bf16 %v1884_v5, %v1880_v9  ;;  %v1879_v38 = vld [vmem:[%s3794_s19 + $0x1c0] sm:$0xff]  ;;  %v2671_v25 = vpack.c.bf16 %v1886_v52, %v1882_v19  ;;  %v1881_v32 = vld [vmem:[%s3794_s19 + $0x1d0] sm:$0xff] }
 0x70b   : > { %2630 = vmatpush1.bf16.msra.mxu0 %v2629_v13  ;;  %v1883_v42 = vld [vmem:[%s3794_s19 + $0x1e0] sm:$0xff]  ;;  %v1885_v62 = vld [vmem:[%s3794_s19 + $0x1f0] sm:$0xff] }
 0x70c   : > { %2662 = vmatpush1.bf16.msra.mxu1 %v2661_v36  ;;  %2632 = vmatprep.subr.bf16.mxu0 %v2631_v44  ;;  %v2641_v20 = vpack.c.bf16 %v1883_v42, %v1879_v38  ;;  %v2673_v41 = vpack.c.bf16 %v1885_v62, %v1881_v32  ;;  %v1822_v4 = vld [vmem:[#allocation3] sm:$0xff] }
 0x70d   : > { %2664 = vmatprep.subr.bf16.mxu1 %v2663_v26 }
 0x70f   : > { %2634 = vmatpush1.bf16.msra.mxu0 %v2633_v31 }
 0x710   : > { %2666 = vmatpush1.bf16.msra.mxu1 %v2665_v17  ;;  %2636 = vmatprep.subr.bf16.mxu0 %v2635_v33 }
 0x711   : > { %2668 = vmatprep.subr.bf16.mxu1 %v2667_v57 }
 0x713   : > { %2638 = vmatpush1.bf16.msra.mxu0 %v2637_v60 }
 0x714   : > { %2670 = vmatpush1.bf16.msra.mxu1 %v2669_v11  ;;  %2640 = vmatprep.subr.bf16.mxu0 %v2639_v7 }
 0x715   : > { %2672 = vmatprep.subr.bf16.mxu1 %v2671_v25 }
 0x717   : > { %2642 = vmatpush1.bf16.msra.mxu0 %v2641_v20 }
 0x718   : > { %2674 = vmatpush1.bf16.msra.mxu1 %v2673_v41 }
 0x71a   : > { %1974 = vmatmul.mubr.f32.vlgmr.msra.gmra.mrb[0].mxu0 %v1822_v4 }
 0x71b   : > { %2045 = vmatmul.mubr.f32.vlgmr.msra.gmra.mrb[0].mxu1 %v1822_v4 }
 0x71c   : > { %3247 = shalt.err (!%p3244_p1)
}
 0x71d   : > { %s4553_s22 = sld [smem:[#allocation70_spill]]  ;;  %p4554_p5 = pmov %p4552_p12 }
 0x723   : > { %s3248_s15 = scalar_lea.hbm %s4553_s22, 128 }
 0x724   : > { %p3249_p4 = scmp.ne.s32.totalorder %s4553_s22, %s3248_s15  ;;  %p3254_p3 = scmp.lt.u32.totalorder %s3248_s15, %s4553_s22 }
 0x726   : > { %p3250_p2 = pnand %p3249_p4, %p4554_p5 }
 0x728   : > { %p3251_p13 = pneg %p3250_p2 }
 0x72a   : > { %p3256_p7 = pnand %p3254_p3, %p3251_p13 }
 0x72c   : > { %3259 = shalt.err (!%p3256_p7)
}
 0x72d   : > { %p4555_p12 = pmov %p4554_p5  ;;  %s3445_s11 = smov [#allocation21]  }
 0x72e   : > { %s2092_s28 = sshll.u32 %s3445_s11, 4  ;;  %p4556_p11 = pmov %p4554_p5  ;;  %s2093_s28 = int_to_ptr.vmem [resolvable:$true] %s2092_s28 }
 0x72f   : > { %2699 = dma.vmem_to_hbm [thread:$0]  (%p4555_p12), %s2082_s5, 128, %s4553_s22, [#allocation20]  }
 0x730   : > { %s3260_s9 = scalar_lea.vmem %s2093_s28, 128  ;;  %p3267_p10 = scmp.lt.s32.totalorder %s2093_s28, %s2093_s28 }
 0x731   : > { %p3261_p9 = scmp.ne.s32.totalorder %s2093_s28, %s3260_s9  ;;  %p3268_p1 = scmp.lt.s32.totalorder %s3260_s9, %s3260_s9 }
 0x733   : > { %p3262_p0 = pnand %p3261_p9, %p4556_p11  ;;  %p3269_p4 = por %p3268_p1, %p3267_p10 }
 0x735   : > { %p3263_p6 = pneg %p3262_p0 }
 0x737   : > { %p3270_p5 = pnand %p3269_p4, %p3263_p6 }
 0x739   : > { %3273 = shalt.err (!%p3270_p5)
}
 0x73a   : > { %s4557_s3 = sld [smem:[#allocation71_spill]]  ;;  %p4558_p13 = pmov %p4556_p11 }
 0x740   : > { %s3274_s12 = scalar_lea.hbm %s4557_s3, 128 }
 0x741   : > { %p3275_p2 = scmp.ne.s32.totalorder %s4557_s3, %s3274_s12  ;;  %p3280_p12 = scmp.lt.u32.totalorder %s3274_s12, %s4557_s3 }
 0x743   : > { %p3276_p3 = pnand %p3275_p2, %p4558_p13 }
 0x745   : > { %p3277_p7 = pneg %p3276_p3 }
 0x747   : > { %p3282_p9 = pnand %p3280_p12, %p3277_p7 }
 0x749   : > { %3285 = shalt.err (!%p3282_p9)
}
 0x74a   : > { %2701 = dma.vmem_to_hbm [thread:$0]  (%p4556_p11), %s2093_s28, 128, %s4557_s3, [#allocation20]  }
 0x74b   : > { %s3446_s20 = smov [#allocation22]   ;;  %p4559_p6 = pmov %p4556_p11 }
 0x74c   : > { %s2103_s4 = sshll.u32 %s3446_s20, 4  ;;  %s2104_s4 = int_to_ptr.vmem [resolvable:$true] %s2103_s4 }
 0x74d   : > { %s3286_s21 = scalar_lea.vmem %s2104_s4, 128  ;;  %p3293_p4 = scmp.lt.s32.totalorder %s2104_s4, %s2104_s4 }
 0x74e   : > { %p3287_p0 = scmp.ne.s32.totalorder %s2104_s4, %s3286_s21  ;;  %p3294_p5 = scmp.lt.s32.totalorder %s3286_s21, %s3286_s21 }
 0x750   : > { %p3288_p10 = pnand %p3287_p0, %p4559_p6  ;;  %p3295_p2 = por %p3294_p5, %p3293_p4 }
 0x752   : > { %p3289_p1 = pneg %p3288_p10 }
 0x754   : > { %p3296_p13 = pnand %p3295_p2, %p3289_p1 }
 0x756   : > { %3299 = shalt.err (!%p3296_p13)
}
 0x757   : > { %s4560_s16 = sld [smem:[#allocation72_spill]]  ;;  %p4561_p7 = pmov %p4559_p6 }
 0x75d   : > { %s3300_s11 = scalar_lea.hbm %s4560_s16, 128 }
 0x75e   : > { %p3301_p3 = scmp.ne.s32.totalorder %s4560_s16, %s3300_s11  ;;  %p3306_p11 = scmp.lt.u32.totalorder %s3300_s11, %s4560_s16 }
 0x760   : > { %p3302_p12 = pnand %p3301_p3, %p4561_p7 }
 0x762   : > { %p3303_p9 = pneg %p3302_p12 }
 0x764   : > { %p3308_p0 = pnand %p3306_p11, %p3303_p9 }
 0x766   : > { %3311 = shalt.err (!%p3308_p0)
}
 0x767   : > { %2703 = dma.vmem_to_hbm [thread:$0]  (%p4559_p6), %s2104_s4, 128, %s4560_s16, [#allocation23]   ;;  %v1889_v22 = vlaneseq }
 0x768   : > { %s4562_s19 = scalar_lea.vmem %s4490_s10, %s4578_s8  ;;  %s2394_s25 = sshll.u32 %s3556_s0, 9 }
 0x769   : > { %v1890_v10 = vshrl.u32 %v1889_v22, 7  ;;  %v1887_v18 = vld [vmem:[%s4562_s19] sm:$0xf]  ;;  %s2070_s15 = sshll.u32 %s3808_s18, 4  ;;  %s4563_s4 = sld [smem:[#allocation69_spill]]  ;;  %s4428_s15 = int_to_ptr.vmem [resolvable:$true] %s2070_s15 }
 0x76a   : > { %s2056_s14 = scalar_lea.sflag [#allocation9], %s3790_s30  ;;  %s3312_s2 = scalar_lea.vmem %s4428_s15, 512 }
 0x76b   : > { %v1891_v21 = vsub.s32 0, %v1890_v10  ;;  %v1899_v45 = vsub.s32 2, %v1890_v10  ;;  %v1895_v23 = vsub.s32 1, %v1890_v10  ;;  %v1903_v30 = vsub.s32 3, %v1890_v10  ;;  %p3313_p10 = scmp.ne.s32.totalorder %s4428_s15, %s3312_s2  ;;  %s3447_s11 = smov [#allocation18]  }
 0x76c   : > { %s3316_s9 = sshll.u32 %s3447_s11, 4  ;;  %s3317_s9 = int_to_ptr.vmem [resolvable:$false] %s3316_s9 }
 0x76d   : > { %v1892_v39 = vrot.slane %v1887_v18, %v1891_v21  ;;  %v1900_v16 = vrot.slane %v1887_v18, %v1899_v45  ;;  %v1896_v1 = vrot.slane %v1887_v18, %v1895_v23  ;;  %v1904_v8 = vrot.slane %v1887_v18, %v1903_v30  ;;  %p3314_p1 = pnand %p3313_p10, %p3728_p8  ;;  %s3318_s28 = scalar_lea.vmem %s3317_s9, 1024 }
 0x76e   : > { %p3319_p5 = scmp.lt.s32.totalorder %s4428_s15, %s3317_s9  ;;  %p3320_p2 = scmp.lt.s32.totalorder %s3318_s28, %s3312_s2 }
 0x76f   : > { %s4426_s21 = scalar_lea.hbm %s4563_s4, %s2394_s25  ;;  %p3315_p4 = pneg %p3314_p1 }
 0x770   : > { %p3321_p13 = por %p3320_p2, %p3319_p5 }
 0x772   : > { %p3322_p3 = pnand %p3321_p13, %p3315_p4 }
 0x7ed   : > { %v1975_v43 = vpop.f32.mrb[0].mxu0 }
 0x7ee   : > { %v1976_v35 = vadd.f32 %v1975_v43, %v1892_v39  ;;  %v2046_v37 = vpop.f32.mrb[0].mxu1  ;;  %v1977_v47 = vpop.f32.mrb[1].mxu0 }
 0x7ef   : > { %v2047_v46 = vadd.f32 %v2046_v37, %v1900_v16  ;;  %v1978_v48 = vadd.f32 %v1977_v47, %v1896_v1  ;;  %v2048_v29 = vpop.f32.mrb[1].mxu1 }
 0x7f0   : > { %2051 = vst [vmem:[%s3808_s18] sm:$0xff] %v1976_v35  ;;  %v2049_v56 = vadd.f32 %v2048_v29, %v1904_v8 }
 0x7f1   : > { %2053 = vst [vmem:[%s3808_s18 + $0x10] sm:$0xff] %v2047_v46  ;;  %2052 = vst [vmem:[%s3808_s18 + $0x8] sm:$0xff] %v1978_v48 }
 0x7f2   : > { %2054 = vst [vmem:[%s3808_s18 + $0x18] sm:$0xff] %v2049_v56 }
 0x7f3   : > { %3325 = shalt.err (!%p3322_p3)
}
 0x7f4   : > { %s3326_s30 = scalar_lea.hbm %s4426_s21, 512  ;;  %s3330_s7 = scalar_lea.hbm %s4563_s4, 2048 }
 0x7f5   : > { %p3327_p7 = scmp.ne.s32.totalorder %s4426_s21, %s3326_s30  ;;  %p3331_p11 = scmp.lt.u32.totalorder %s4426_s21, %s4563_s4 }
 0x7f6   : > { %p3332_p0 = scmp.lt.u32.totalorder %s3330_s7, %s3326_s30  ;;  %p3334_p10 = scmp.lt.u32.totalorder %s3326_s30, %s4426_s21 }
 0x7f7   : > { %p3328_p12 = pnand %p3327_p7, %p3728_p8 }
 0x7f8   : > { %p3333_p6 = por %p3332_p0, %p3331_p11 }
 0x7f9   : > { %p3329_p9 = pneg %p3328_p12 }
 0x7fa   : > { %p3335_p1 = por %p3334_p10, %p3333_p6 }
 0x7fc   : > { %p3336_p4 = pnand %p3335_p1, %p3329_p9 }
 0x7fe   : > { %3339 = shalt.err (!%p3336_p4)
}
 0x7ff   : > { %2697 = dma.vmem_to_hbm [thread:$0]  (%p3728_p8), %s4428_s15, 512, %s4426_s21, %s2056_s14  }
 0x800   : > { %p4564_p5 = scmp.eq.s32.totalorder %s3556_s0, 3 }
 0x802   : > { %3391 = dma.done.wait (%p4564_p5), [#allocation20], 256   ;;  %p4565_p2 = pmov %p4564_p5 }
 0x804   : > { %3393 = vsyncadd (%p4565_p2), [#allocation20], 4294967040  ;;  %p4566_p13 = pmov %p4565_p2 }
 0x805   : > { %p4567_p3 = pmov %p4565_p2 }
 0x806   : > { %3395 = dma.done.wait (%p4566_p13), [#allocation23], 128  }
 0x807   : > { %3397 = vsyncadd (%p4567_p3), [#allocation23], 4294967168 }
 0x808 PF: > { %s4568_s5 = sld [smem:[#allocation58_spill]]  ;;  %s4569_s23 = sld [smem:[#allocation60_spill]] }
 0x809   : > { %p2752_p7 = scmp.ge.s32.totalorder %s3416_s26, 2 }
 0x80e   : > { %s2127_s17 = sand.u32 1, %s4568_s5   ;;  %p4570_p12 = scmp.ne.s32.totalorder %s4569_s23, 0 }
 0x80f   : > { %s2128_s19 = scalar_lea.sflag [#allocation9], %s2127_s17 }
 0x810   : > { %p2732_p9 = pnand %p2752_p7, %p4570_p12 }
 0x812   : > { %3399 = dma.done.wait (!%p2732_p9), %s2128_s19, 512  }
 0x813   : > { %3401 = vsyncadd (!%p2732_p9), %s2128_s19, 4294966784  ;;  %s4571_s25 = sld [smem:[#allocation59_spill]]  ;;  %s4572_s15 = sld [smem:[#allocation61_spill]] }
 0x814   : > { %p37_p8 = scmp.ge.s32.totalorder %s3714_s29, 6   ;;  %s4573_s23 = smov %s3408_s24 }
 0x815   : > { %s4576_s26 = smov %s3714_s29 }
 0x816   :  { %39 = sbr.rel (!%p37_p8) target bundleno = 28 (0x1c), region = 214 }
 0x819   : > { %s4574_s24 = smov %s4571_s25  ;;  %s4575_s25 = smov %s4572_s15 }
 0x81d   :  { %2133 = vsyncpa [#allocation8], 1 }
 0x81e   :  { %2135 = vsyncpa [#allocation8 + $0x1], 1 }
 0x81f   :  { %2136 = vsyncpa [#allocation11], 1 }
 0x820   :  { %2137 = vsyncpa [#allocation14], 1 }
 0x821   :  { %2138 = vsyncpa [#allocation17], 1 }
 0x822   :  { %2140 = vsyncpa [#allocation17 + $0x1], 1 }
 0x823   :  { %2141 = vsyncpa [#allocation9], 1 }
 0x824   :  { %2143 = vsyncpa [#allocation9 + $0x1], 1 }
 0x825   :  { %2144 = vsyncpa [#allocation20], 1 }
 0x826   :  { %2145 = vsyncpa [#allocation23], 1 }
 0x827   :  { %2146 = vsyncmov [#allocation4] }
 0x82a   :  { %s2147_s26 = vpop.sfrf %2146 }
 0x82b   :  { %p2385_p11 = scmp.ne.s32.totalorder %s2147_s26, 0 }
 0x82d   :  { %2151 = shalt.err (%p2385_p11)  }
 0x82e   :  { %2153 = vsyncmov [#allocation4 + $0x1] }
 0x831   :  { %s2154_s0 = vpop.sfrf %2153 }
 0x832   :  { %p2386_p0 = scmp.ne.s32.totalorder %s2154_s0, 0 }
 0x834   :  { %2158 = shalt.err (%p2386_p0)  }
 0x835   :  { %2160 = vsyncmov [#allocation4 + $0x2] }
 0x838   :  { %s2161_s29 = vpop.sfrf %2160 }
 0x839   :  { %p2387_p6 = scmp.ne.s32.totalorder %s2161_s29, 0 }
 0x83b   :  { %2165 = shalt.err (%p2387_p6)  }
 0x83c   :  { %2167 = vsyncmov [#allocation4 + $0x3] }
 0x83f   :  { %s2168_s1 = vpop.sfrf %2167 }
 0x840   :  { %p2388_p10 = scmp.ne.s32.totalorder %s2168_s1, 0 }
 0x842   :  { %2172 = shalt.err (%p2388_p10)  }
 0x843   :  { %2174 = vsyncmov [#allocation4 + $0x4] }
 0x846   :  { %s2175_s6 = vpop.sfrf %2174 }
 0x847   :  { %p2389_p1 = scmp.ne.s32.totalorder %s2175_s6, 0 }
 0x849   :  { %2179 = shalt.err (%p2389_p1)  }
 0x84a   :  { %2181 = vsyncmov [#allocation4 + $0x5] }
 0x84d   :  { %s2182_s10 = vpop.sfrf %2181 }
 0x84e   :  { %p2390_p4 = scmp.ne.s32.totalorder %s2182_s10, 0 }
 0x850   :  { %2186 = shalt.err (%p2390_p4)  }
 0x851   :  { %2188 = vsyncmov [#allocation4 + $0x6] }
 0x854   :  { %s2189_s24 = vpop.sfrf %2188 }
 0x855   :  { %p2391_p5 = scmp.ne.s32.totalorder %s2189_s24, 0 }
 0x857   :  { %2193 = shalt.err (%p2391_p5)  }
 0x858   :  { %2195 = vsyncmov [#allocation4 + $0x7] }
 0x85b   :  { %s2196_s22 = vpop.sfrf %2195 }
 0x85c   :  { %p2392_p2 = scmp.ne.s32.totalorder %s2196_s22, 0 }
 0x85e   :  { %2200 = shalt.err (%p2392_p2)  }

</bundles_post_ra>
